<compile_context>
chip_gen: v5e
topology: v5e:2x2
jax: 0.10.0
libtpu: 0.0.40
codegen_flags: <defaults>
</compile_context>

<pallas_src>
import functools

import jax
import jax.numpy as jnp
from jax.experimental import pallas as pl
from jax.experimental.pallas import tpu as pltpu


# ----------------------------------------------------------------------------
# Fused Pallas kernel: all GRU layers + FC in one invocation
# ----------------------------------------------------------------------------
def _gru_net_kernel(*refs, hidden, num_layers, seq_len, batch):
    H = hidden
    T = seq_len
    B = batch

    x_ref = refs[0]                                   # (T*B, In)  time-major
    layer_refs = refs[1:1 + 4 * num_layers]           # per layer: w_ih, w_hh, b_ih, b_hh
    fc_w_ref = refs[1 + 4 * num_layers]                # (H, 32)
    fc_b_ref = refs[2 + 4 * num_layers]                # (1, 32)
    out_ref = refs[3 + 4 * num_layers]                 # (B, 32)
    zx_ref = refs[4 + 4 * num_layers]                  # scratch (T*B, 3H)
    seq_ref = refs[5 + 4 * num_layers]                 # scratch (T*B, H)

    h_last = jnp.zeros((B, H), jnp.float32)
    for layer in range(num_layers):
        w_ih_ref, w_hh_ref, b_ih_ref, b_hh_ref = layer_refs[4 * layer: 4 * layer + 4]

        inp = x_ref[...] if layer == 0 else seq_ref[...]        # (T*B, in)

        # Hoisted input-side matmul for the whole sequence (no recurrent dep).
        zx_ref[...] = (jnp.dot(inp, w_ih_ref[...],
                               preferred_element_type=jnp.float32)
                       + b_ih_ref[...])

        w_hh = w_hh_ref[...]
        b_hh = b_hh_ref[...]
        last_layer = (layer == num_layers - 1)

        h = jnp.zeros((B, H), jnp.float32)
        for t in range(T):                                      # static unroll (T small)
            zx_t = zx_ref[pl.ds(t * B, B), :]                   # (B, 3H)
            zh = jnp.dot(h, w_hh, preferred_element_type=jnp.float32) + b_hh
            # PyTorch GRU gate order: [r, z, n]
            rz = jax.nn.sigmoid(zx_t[:, :2 * H] + zh[:, :2 * H])
            r = rz[:, :H]
            z = rz[:, H:]
            n = jnp.tanh(zx_t[:, 2 * H:] + r * zh[:, 2 * H:])
            h = (1.0 - z) * n + z * h
            if not last_layer:
                # inter-layer activations never leave VMEM
                seq_ref[pl.ds(t * B, B), :] = h
        h_last = h

    # Final Linear on the last hidden state only.
    out_ref[...] = (jnp.dot(h_last, fc_w_ref[...],
                            preferred_element_type=jnp.float32)
                    + fc_b_ref[...]).astype(out_ref.dtype)


# ----------------------------------------------------------------------------
# Wrapper
# ----------------------------------------------------------------------------
def simple_gru_forward(x_bti, params):
    """Full SimpleGRU.forward: x (B, T, In) -> (B, 32)."""
    B, T, In = x_bti.shape
    layers = params["gru"]
    H = layers[0]["w_hh"].shape[0]
    num_layers = len(layers)
    out_dim = params["fc_w"].shape[1]

    # Time-major flatten so the hoisted matmul sees a plain 2-D operand.
    x2d = jnp.transpose(x_bti, (1, 0, 2)).reshape(T * B, In).astype(jnp.float32)

    args = [x2d]
    for layer in layers:
        args += [layer["w_ih"], layer["w_hh"], layer["b_ih"], layer["b_hh"]]
    args += [params["fc_w"], params["fc_b"]]

    kernel = functools.partial(_gru_net_kernel, hidden=H, num_layers=num_layers,
                               seq_len=T, batch=B)
    vmem = pl.BlockSpec(memory_space=pltpu.MemorySpace.VMEM)
    return pl.pallas_call(
        kernel,
        out_shape=jax.ShapeDtypeStruct((B, out_dim), jnp.float32),
        in_specs=[vmem] * len(args),
        out_specs=vmem,
        scratch_shapes=[
            pltpu.VMEM((T * B, 3 * H), jnp.float32),   # hoisted x @ W_ih (+ b_ih)
            pltpu.VMEM((T * B, H), jnp.float32),       # inter-layer sequence buffer
        ],
    )(*args)


# ----------------------------------------------------------------------------
# Deterministic parameter init (mirrors nn.GRU / nn.Linear shapes)
# ----------------------------------------------------------------------------
def init_params(key, input_size, hidden_size, num_layers, fc_out=32):
    k = 1.0 / jnp.sqrt(hidden_size)
    layers = []
    for layer_idx in range(num_layers):
        in_sz = input_size if layer_idx == 0 else hidden_size
        key, k1, k2, k3, k4 = jax.random.split(key, 5)
        w_ih = jax.random.uniform(k1, (3 * hidden_size, in_sz), jnp.float32, -k, k)
        w_hh = jax.random.uniform(k2, (3 * hidden_size, hidden_size), jnp.float32, -k, k)
        b_ih = jax.random.uniform(k3, (3 * hidden_size,), jnp.float32, -k, k)
        b_hh = jax.random.uniform(k4, (3 * hidden_size,), jnp.float32, -k, k)
        layers.append({
            "w_ih": w_ih.T,            # (in, 3H), gate order [r, z, n]
            "w_hh": w_hh.T,            # (H, 3H)
            "b_ih": b_ih[None, :],     # (1, 3H)
            "b_hh": b_hh[None, :],     # (1, 3H)  kept separate: b_hn is gated by r
        })
    key, k5, k6 = jax.random.split(key, 3)
    kf = 1.0 / jnp.sqrt(hidden_size)
    fc_w = jax.random.uniform(k5, (fc_out, hidden_size), jnp.float32, -kf, kf)
    fc_b = jax.random.uniform(k6, (fc_out,), jnp.float32, -kf, kf)
    return {"gru": layers, "fc_w": fc_w.T, "fc_b": fc_b[None, :]}


# ----------------------------------------------------------------------------
# Pure-JAX reference (correctness check only)
# ----------------------------------------------------------------------------
def reference_forward(x_bti, params):
    x = jnp.transpose(x_bti, (1, 0, 2))                 # (T, B, In)
    for layer in params["gru"]:
        H = layer["w_hh"].shape[0]
        B = x.shape[1]
        h = jnp.zeros((B, H), jnp.float32)
        outs = []
        for t in range(x.shape[0]):
            zx = x[t] @ layer["w_ih"] + layer["b_ih"][0]
            zh = h @ layer["w_hh"] + layer["b_hh"][0]
            r = jax.nn.sigmoid(zx[:, :H] + zh[:, :H])
            z = jax.nn.sigmoid(zx[:, H:2 * H] + zh[:, H:2 * H])
            n = jnp.tanh(zx[:, 2 * H:] + r * zh[:, 2 * H:])
            h = (1.0 - z) * n + z * h
            outs.append(h)
        x = jnp.stack(outs, axis=0)
    return x[-1] @ params["fc_w"] + params["fc_b"][0]


# ----------------------------------------------------------------------------
if __name__ == "__main__":
    INPUT_SIZE = 16
    HIDDEN_SIZE = 32
    NUM_LAYERS = 2
    BATCH = 2
    SEQ = 8

    root = jax.random.PRNGKey(0)
    k_params, k_x = jax.random.split(root)
    params = init_params(k_params, INPUT_SIZE, HIDDEN_SIZE, NUM_LAYERS)
    x = jax.random.normal(k_x, (BATCH, SEQ, INPUT_SIZE), jnp.float32)

    out = simple_gru_forward(x, params)
    out = jax.block_until_ready(out)

    ref = reference_forward(x, params)
    assert out.shape == (BATCH, 32)
    assert jnp.allclose(out, ref, atol=1e-4, rtol=1e-4), "mismatch vs reference"

    print("KERNEL_OK")
</pallas_src>

<mosaic_0001>
module attributes {stable_mosaic.version = 11 : i64} {
  func.func @_gru_net_kernel(%arg0: memref<16x16xf32, #tpu.memory_space<vmem>>, %arg1: memref<16x96xf32, #tpu.memory_space<vmem>>, %arg2: memref<32x96xf32, #tpu.memory_space<vmem>>, %arg3: memref<1x96xf32, #tpu.memory_space<vmem>>, %arg4: memref<1x96xf32, #tpu.memory_space<vmem>>, %arg5: memref<32x96xf32, #tpu.memory_space<vmem>>, %arg6: memref<32x96xf32, #tpu.memory_space<vmem>>, %arg7: memref<1x96xf32, #tpu.memory_space<vmem>>, %arg8: memref<1x96xf32, #tpu.memory_space<vmem>>, %arg9: memref<32x32xf32, #tpu.memory_space<vmem>>, %arg10: memref<1x32xf32, #tpu.memory_space<vmem>>, %arg11: memref<2x32xf32, #tpu.memory_space<vmem>>, %arg12: memref<16x96xf32, #tpu.memory_space<vmem>>, %arg13: memref<16x32xf32, #tpu.memory_space<vmem>>) attributes {dimension_semantics = [], scalar_prefetch = 0 : i64, scratch_operands = 2 : i64, tpu.core_type = #tpu.core_type<tc>} {
    %c0 = arith.constant 0 : index
    %c0_0 = arith.constant 0 : index
    %0 = vector.load %arg0[%c0, %c0_0] : memref<16x16xf32, #tpu.memory_space<vmem>>, vector<16x16xf32>
    %c0_1 = arith.constant 0 : index
    %c0_2 = arith.constant 0 : index
    %1 = vector.load %arg1[%c0_1, %c0_2] : memref<16x96xf32, #tpu.memory_space<vmem>>, vector<16x96xf32>
    %cst = arith.constant dense<0.000000e+00> : vector<16x96xf32>
    %2 = tpu.matmul %0, %1, %cst {dimension_numbers = #tpu.dot_dimension_numbers<[1], [0], [0], [1], [0, 0, 1, 1], [], []>} : vector<16x16xf32>, vector<16x96xf32>, vector<16x96xf32> -> vector<16x96xf32>
    %c0_3 = arith.constant 0 : index
    %c0_4 = arith.constant 0 : index
    %3 = vector.load %arg3[%c0_3, %c0_4] : memref<1x96xf32, #tpu.memory_space<vmem>>, vector<1x96xf32>
    %4 = vector.broadcast %3 : vector<1x96xf32> to vector<16x96xf32>
    %5 = arith.addf %2, %4 : vector<16x96xf32>
    %c0_5 = arith.constant 0 : index
    %c0_6 = arith.constant 0 : index
    %6 = vector.load %arg12[%c0_5, %c0_6] : memref<16x96xf32, #tpu.memory_space<vmem>>, vector<16x96xf32>
    tpu.vector_store %arg12[%c0_5, %c0_6], %5 {strides = array<i32>} : memref<16x96xf32, #tpu.memory_space<vmem>>, vector<16x96xf32>,
    %c0_7 = arith.constant 0 : index
    %c0_8 = arith.constant 0 : index
    %7 = vector.load %arg2[%c0_7, %c0_8] : memref<32x96xf32, #tpu.memory_space<vmem>>, vector<32x96xf32>
    %c0_9 = arith.constant 0 : index
    %c0_10 = arith.constant 0 : index
    %8 = vector.load %arg4[%c0_9, %c0_10] : memref<1x96xf32, #tpu.memory_space<vmem>>, vector<1x96xf32>
    %cst_11 = arith.constant 0.000000e+00 : f32
    %9 = vector.broadcast %cst_11 : f32 to vector<2x32xf32>
    %c0_12 = arith.constant 0 : index
    %c0_13 = arith.constant 0 : index
    %10 = vector.load %arg12[%c0_12, %c0_13] : memref<16x96xf32, #tpu.memory_space<vmem>>, vector<2x96xf32>
    %cst_14 = arith.constant dense<0.000000e+00> : vector<2x96xf32>
    %11 = tpu.matmul %9, %7, %cst_14 {dimension_numbers = #tpu.dot_dimension_numbers<[1], [0], [0], [1], [0, 0, 1, 1], [], []>} : vector<2x32xf32>, vector<32x96xf32>, vector<2x96xf32> -> vector<2x96xf32>
    %12 = vector.broadcast %8 : vector<1x96xf32> to vector<2x96xf32>
    %13 = arith.addf %11, %12 : vector<2x96xf32>
    %14 = vector.extract_strided_slice %10 {offsets = [0, 0], sizes = [2, 64], strides = [1, 1]} : vector<2x96xf32> to vector<2x64xf32>
    %15 = vector.extract_strided_slice %13 {offsets = [0, 0], sizes = [2, 64], strides = [1, 1]} : vector<2x96xf32> to vector<2x64xf32>
    %16 = arith.addf %14, %15 : vector<2x64xf32>
    %17 = arith.negf %16 : vector<2x64xf32>
    %18 = math.exp %17 : vector<2x64xf32>
    %cst_15 = arith.constant 1.000000e+00 : f32
    %19 = vector.broadcast %cst_15 : f32 to vector<2x64xf32>
    %20 = arith.addf %19, %18 : vector<2x64xf32>
    %21 = arith.divf %19, %20 : vector<2x64xf32>
    %22 = vector.extract_strided_slice %21 {offsets = [0, 0], sizes = [2, 32], strides = [1, 1]} : vector<2x64xf32> to vector<2x32xf32>
    %23 = vector.extract_strided_slice %21 {offsets = [0, 32], sizes = [2, 32], strides = [1, 1]} : vector<2x64xf32> to vector<2x32xf32>
    %24 = vector.extract_strided_slice %10 {offsets = [0, 64], sizes = [2, 32], strides = [1, 1]} : vector<2x96xf32> to vector<2x32xf32>
    %25 = vector.extract_strided_slice %13 {offsets = [0, 64], sizes = [2, 32], strides = [1, 1]} : vector<2x96xf32> to vector<2x32xf32>
    %26 = arith.mulf %22, %25 : vector<2x32xf32>
    %27 = arith.addf %24, %26 : vector<2x32xf32>
    %28 = math.tanh %27 : vector<2x32xf32>
    %cst_16 = arith.constant 1.000000e+00 : f32
    %29 = vector.broadcast %cst_16 : f32 to vector<2x32xf32>
    %30 = arith.subf %29, %23 : vector<2x32xf32>
    %31 = arith.mulf %30, %28 : vector<2x32xf32>
    %32 = arith.mulf %23, %9 : vector<2x32xf32>
    %33 = arith.addf %31, %32 : vector<2x32xf32>
    %c0_17 = arith.constant 0 : index
    %c0_18 = arith.constant 0 : index
    %34 = vector.load %arg13[%c0_17, %c0_18] : memref<16x32xf32, #tpu.memory_space<vmem>>, vector<2x32xf32>
    tpu.vector_store %arg13[%c0_17, %c0_18], %33 {strides = array<i32>} : memref<16x32xf32, #tpu.memory_space<vmem>>, vector<2x32xf32>,
    %c2 = arith.constant 2 : index
    %c0_19 = arith.constant 0 : index
    %35 = vector.load %arg12[%c2, %c0_19] : memref<16x96xf32, #tpu.memory_space<vmem>>, vector<2x96xf32>
    %cst_20 = arith.constant dense<0.000000e+00> : vector<2x96xf32>
    %36 = tpu.matmul %33, %7, %cst_20 {dimension_numbers = #tpu.dot_dimension_numbers<[1], [0], [0], [1], [0, 0, 1, 1], [], []>} : vector<2x32xf32>, vector<32x96xf32>, vector<2x96xf32> -> vector<2x96xf32>
    %37 = vector.broadcast %8 : vector<1x96xf32> to vector<2x96xf32>
    %38 = arith.addf %36, %37 : vector<2x96xf32>
    %39 = vector.extract_strided_slice %35 {offsets = [0, 0], sizes = [2, 64], strides = [1, 1]} : vector<2x96xf32> to vector<2x64xf32>
    %40 = vector.extract_strided_slice %38 {offsets = [0, 0], sizes = [2, 64], strides = [1, 1]} : vector<2x96xf32> to vector<2x64xf32>
    %41 = arith.addf %39, %40 : vector<2x64xf32>
    %42 = arith.negf %41 : vector<2x64xf32>
    %43 = math.exp %42 : vector<2x64xf32>
    %cst_21 = arith.constant 1.000000e+00 : f32
    %44 = vector.broadcast %cst_21 : f32 to vector<2x64xf32>
    %45 = arith.addf %44, %43 : vector<2x64xf32>
    %46 = arith.divf %44, %45 : vector<2x64xf32>
    %47 = vector.extract_strided_slice %46 {offsets = [0, 0], sizes = [2, 32], strides = [1, 1]} : vector<2x64xf32> to vector<2x32xf32>
    %48 = vector.extract_strided_slice %46 {offsets = [0, 32], sizes = [2, 32], strides = [1, 1]} : vector<2x64xf32> to vector<2x32xf32>
    %49 = vector.extract_strided_slice %35 {offsets = [0, 64], sizes = [2, 32], strides = [1, 1]} : vector<2x96xf32> to vector<2x32xf32>
    %50 = vector.extract_strided_slice %38 {offsets = [0, 64], sizes = [2, 32], strides = [1, 1]} : vector<2x96xf32> to vector<2x32xf32>
    %51 = arith.mulf %47, %50 : vector<2x32xf32>
    %52 = arith.addf %49, %51 : vector<2x32xf32>
    %53 = math.tanh %52 : vector<2x32xf32>
    %cst_22 = arith.constant 1.000000e+00 : f32
    %54 = vector.broadcast %cst_22 : f32 to vector<2x32xf32>
    %55 = arith.subf %54, %48 : vector<2x32xf32>
    %56 = arith.mulf %55, %53 : vector<2x32xf32>
    %57 = arith.mulf %48, %33 : vector<2x32xf32>
    %58 = arith.addf %56, %57 : vector<2x32xf32>
    %c2_23 = arith.constant 2 : index
    %c0_24 = arith.constant 0 : index
    %59 = vector.load %arg13[%c2_23, %c0_24] : memref<16x32xf32, #tpu.memory_space<vmem>>, vector<2x32xf32>
    tpu.vector_store %arg13[%c2_23, %c0_24], %58 {strides = array<i32>} : memref<16x32xf32, #tpu.memory_space<vmem>>, vector<2x32xf32>,
    %c4 = arith.constant 4 : index
    %c0_25 = arith.constant 0 : index
    %60 = vector.load %arg12[%c4, %c0_25] : memref<16x96xf32, #tpu.memory_space<vmem>>, vector<2x96xf32>
    %cst_26 = arith.constant dense<0.000000e+00> : vector<2x96xf32>
    %61 = tpu.matmul %58, %7, %cst_26 {dimension_numbers = #tpu.dot_dimension_numbers<[1], [0], [0], [1], [0, 0, 1, 1], [], []>} : vector<2x32xf32>, vector<32x96xf32>, vector<2x96xf32> -> vector<2x96xf32>
    %62 = vector.broadcast %8 : vector<1x96xf32> to vector<2x96xf32>
    %63 = arith.addf %61, %62 : vector<2x96xf32>
    %64 = vector.extract_strided_slice %60 {offsets = [0, 0], sizes = [2, 64], strides = [1, 1]} : vector<2x96xf32> to vector<2x64xf32>
    %65 = vector.extract_strided_slice %63 {offsets = [0, 0], sizes = [2, 64], strides = [1, 1]} : vector<2x96xf32> to vector<2x64xf32>
    %66 = arith.addf %64, %65 : vector<2x64xf32>
    %67 = arith.negf %66 : vector<2x64xf32>
    %68 = math.exp %67 : vector<2x64xf32>
    %cst_27 = arith.constant 1.000000e+00 : f32
    %69 = vector.broadcast %cst_27 : f32 to vector<2x64xf32>
    %70 = arith.addf %69, %68 : vector<2x64xf32>
    %71 = arith.divf %69, %70 : vector<2x64xf32>
    %72 = vector.extract_strided_slice %71 {offsets = [0, 0], sizes = [2, 32], strides = [1, 1]} : vector<2x64xf32> to vector<2x32xf32>
    %73 = vector.extract_strided_slice %71 {offsets = [0, 32], sizes = [2, 32], strides = [1, 1]} : vector<2x64xf32> to vector<2x32xf32>
    %74 = vector.extract_strided_slice %60 {offsets = [0, 64], sizes = [2, 32], strides = [1, 1]} : vector<2x96xf32> to vector<2x32xf32>
    %75 = vector.extract_strided_slice %63 {offsets = [0, 64], sizes = [2, 32], strides = [1, 1]} : vector<2x96xf32> to vector<2x32xf32>
    %76 = arith.mulf %72, %75 : vector<2x32xf32>
    %77 = arith.addf %74, %76 : vector<2x32xf32>
    %78 = math.tanh %77 : vector<2x32xf32>
    %cst_28 = arith.constant 1.000000e+00 : f32
    %79 = vector.broadcast %cst_28 : f32 to vector<2x32xf32>
    %80 = arith.subf %79, %73 : vector<2x32xf32>
    %81 = arith.mulf %80, %78 : vector<2x32xf32>
    %82 = arith.mulf %73, %58 : vector<2x32xf32>
    %83 = arith.addf %81, %82 : vector<2x32xf32>
    %c4_29 = arith.constant 4 : index
    %c0_30 = arith.constant 0 : index
    %84 = vector.load %arg13[%c4_29, %c0_30] : memref<16x32xf32, #tpu.memory_space<vmem>>, vector<2x32xf32>
    tpu.vector_store %arg13[%c4_29, %c0_30], %83 {strides = array<i32>} : memref<16x32xf32, #tpu.memory_space<vmem>>, vector<2x32xf32>,
    %c6 = arith.constant 6 : index
    %c0_31 = arith.constant 0 : index
    %85 = vector.load %arg12[%c6, %c0_31] : memref<16x96xf32, #tpu.memory_space<vmem>>, vector<2x96xf32>
    %cst_32 = arith.constant dense<0.000000e+00> : vector<2x96xf32>
    %86 = tpu.matmul %83, %7, %cst_32 {dimension_numbers = #tpu.dot_dimension_numbers<[1], [0], [0], [1], [0, 0, 1, 1], [], []>} : vector<2x32xf32>, vector<32x96xf32>, vector<2x96xf32> -> vector<2x96xf32>
    %87 = vector.broadcast %8 : vector<1x96xf32> to vector<2x96xf32>
    %88 = arith.addf %86, %87 : vector<2x96xf32>
    %89 = vector.extract_strided_slice %85 {offsets = [0, 0], sizes = [2, 64], strides = [1, 1]} : vector<2x96xf32> to vector<2x64xf32>
    %90 = vector.extract_strided_slice %88 {offsets = [0, 0], sizes = [2, 64], strides = [1, 1]} : vector<2x96xf32> to vector<2x64xf32>
    %91 = arith.addf %89, %90 : vector<2x64xf32>
    %92 = arith.negf %91 : vector<2x64xf32>
    %93 = math.exp %92 : vector<2x64xf32>
    %cst_33 = arith.constant 1.000000e+00 : f32
    %94 = vector.broadcast %cst_33 : f32 to vector<2x64xf32>
    %95 = arith.addf %94, %93 : vector<2x64xf32>
    %96 = arith.divf %94, %95 : vector<2x64xf32>
    %97 = vector.extract_strided_slice %96 {offsets = [0, 0], sizes = [2, 32], strides = [1, 1]} : vector<2x64xf32> to vector<2x32xf32>
    %98 = vector.extract_strided_slice %96 {offsets = [0, 32], sizes = [2, 32], strides = [1, 1]} : vector<2x64xf32> to vector<2x32xf32>
    %99 = vector.extract_strided_slice %85 {offsets = [0, 64], sizes = [2, 32], strides = [1, 1]} : vector<2x96xf32> to vector<2x32xf32>
    %100 = vector.extract_strided_slice %88 {offsets = [0, 64], sizes = [2, 32], strides = [1, 1]} : vector<2x96xf32> to vector<2x32xf32>
    %101 = arith.mulf %97, %100 : vector<2x32xf32>
    %102 = arith.addf %99, %101 : vector<2x32xf32>
    %103 = math.tanh %102 : vector<2x32xf32>
    %cst_34 = arith.constant 1.000000e+00 : f32
    %104 = vector.broadcast %cst_34 : f32 to vector<2x32xf32>
    %105 = arith.subf %104, %98 : vector<2x32xf32>
    %106 = arith.mulf %105, %103 : vector<2x32xf32>
    %107 = arith.mulf %98, %83 : vector<2x32xf32>
    %108 = arith.addf %106, %107 : vector<2x32xf32>
    %c6_35 = arith.constant 6 : index
    %c0_36 = arith.constant 0 : index
    %109 = vector.load %arg13[%c6_35, %c0_36] : memref<16x32xf32, #tpu.memory_space<vmem>>, vector<2x32xf32>
    tpu.vector_store %arg13[%c6_35, %c0_36], %108 {strides = array<i32>} : memref<16x32xf32, #tpu.memory_space<vmem>>, vector<2x32xf32>,
    %c8 = arith.constant 8 : index
    %c0_37 = arith.constant 0 : index
    %110 = vector.load %arg12[%c8, %c0_37] : memref<16x96xf32, #tpu.memory_space<vmem>>, vector<2x96xf32>
    %cst_38 = arith.constant dense<0.000000e+00> : vector<2x96xf32>
    %111 = tpu.matmul %108, %7, %cst_38 {dimension_numbers = #tpu.dot_dimension_numbers<[1], [0], [0], [1], [0, 0, 1, 1], [], []>} : vector<2x32xf32>, vector<32x96xf32>, vector<2x96xf32> -> vector<2x96xf32>
    %112 = vector.broadcast %8 : vector<1x96xf32> to vector<2x96xf32>
    %113 = arith.addf %111, %112 : vector<2x96xf32>
    %114 = vector.extract_strided_slice %110 {offsets = [0, 0], sizes = [2, 64], strides = [1, 1]} : vector<2x96xf32> to vector<2x64xf32>
    %115 = vector.extract_strided_slice %113 {offsets = [0, 0], sizes = [2, 64], strides = [1, 1]} : vector<2x96xf32> to vector<2x64xf32>
    %116 = arith.addf %114, %115 : vector<2x64xf32>
    %117 = arith.negf %116 : vector<2x64xf32>
    %118 = math.exp %117 : vector<2x64xf32>
    %cst_39 = arith.constant 1.000000e+00 : f32
    %119 = vector.broadcast %cst_39 : f32 to vector<2x64xf32>
    %120 = arith.addf %119, %118 : vector<2x64xf32>
    %121 = arith.divf %119, %120 : vector<2x64xf32>
    %122 = vector.extract_strided_slice %121 {offsets = [0, 0], sizes = [2, 32], strides = [1, 1]} : vector<2x64xf32> to vector<2x32xf32>
    %123 = vector.extract_strided_slice %121 {offsets = [0, 32], sizes = [2, 32], strides = [1, 1]} : vector<2x64xf32> to vector<2x32xf32>
    %124 = vector.extract_strided_slice %110 {offsets = [0, 64], sizes = [2, 32], strides = [1, 1]} : vector<2x96xf32> to vector<2x32xf32>
    %125 = vector.extract_strided_slice %113 {offsets = [0, 64], sizes = [2, 32], strides = [1, 1]} : vector<2x96xf32> to vector<2x32xf32>
    %126 = arith.mulf %122, %125 : vector<2x32xf32>
    %127 = arith.addf %124, %126 : vector<2x32xf32>
    %128 = math.tanh %127 : vector<2x32xf32>
    %cst_40 = arith.constant 1.000000e+00 : f32
    %129 = vector.broadcast %cst_40 : f32 to vector<2x32xf32>
    %130 = arith.subf %129, %123 : vector<2x32xf32>
    %131 = arith.mulf %130, %128 : vector<2x32xf32>
    %132 = arith.mulf %123, %108 : vector<2x32xf32>
    %133 = arith.addf %131, %132 : vector<2x32xf32>
    %c8_41 = arith.constant 8 : index
    %c0_42 = arith.constant 0 : index
    %134 = vector.load %arg13[%c8_41, %c0_42] : memref<16x32xf32, #tpu.memory_space<vmem>>, vector<2x32xf32>
    tpu.vector_store %arg13[%c8_41, %c0_42], %133 {strides = array<i32>} : memref<16x32xf32, #tpu.memory_space<vmem>>, vector<2x32xf32>,
    %c10 = arith.constant 10 : index
    %c0_43 = arith.constant 0 : index
    %135 = vector.load %arg12[%c10, %c0_43] : memref<16x96xf32, #tpu.memory_space<vmem>>, vector<2x96xf32>
    %cst_44 = arith.constant dense<0.000000e+00> : vector<2x96xf32>
    %136 = tpu.matmul %133, %7, %cst_44 {dimension_numbers = #tpu.dot_dimension_numbers<[1], [0], [0], [1], [0, 0, 1, 1], [], []>} : vector<2x32xf32>, vector<32x96xf32>, vector<2x96xf32> -> vector<2x96xf32>
    %137 = vector.broadcast %8 : vector<1x96xf32> to vector<2x96xf32>
    %138 = arith.addf %136, %137 : vector<2x96xf32>
    %139 = vector.extract_strided_slice %135 {offsets = [0, 0], sizes = [2, 64], strides = [1, 1]} : vector<2x96xf32> to vector<2x64xf32>
    %140 = vector.extract_strided_slice %138 {offsets = [0, 0], sizes = [2, 64], strides = [1, 1]} : vector<2x96xf32> to vector<2x64xf32>
    %141 = arith.addf %139, %140 : vector<2x64xf32>
    %142 = arith.negf %141 : vector<2x64xf32>
    %143 = math.exp %142 : vector<2x64xf32>
    %cst_45 = arith.constant 1.000000e+00 : f32
    %144 = vector.broadcast %cst_45 : f32 to vector<2x64xf32>
    %145 = arith.addf %144, %143 : vector<2x64xf32>
    %146 = arith.divf %144, %145 : vector<2x64xf32>
    %147 = vector.extract_strided_slice %146 {offsets = [0, 0], sizes = [2, 32], strides = [1, 1]} : vector<2x64xf32> to vector<2x32xf32>
    %148 = vector.extract_strided_slice %146 {offsets = [0, 32], sizes = [2, 32], strides = [1, 1]} : vector<2x64xf32> to vector<2x32xf32>
    %149 = vector.extract_strided_slice %135 {offsets = [0, 64], sizes = [2, 32], strides = [1, 1]} : vector<2x96xf32> to vector<2x32xf32>
    %150 = vector.extract_strided_slice %138 {offsets = [0, 64], sizes = [2, 32], strides = [1, 1]} : vector<2x96xf32> to vector<2x32xf32>
    %151 = arith.mulf %147, %150 : vector<2x32xf32>
    %152 = arith.addf %149, %151 : vector<2x32xf32>
    %153 = math.tanh %152 : vector<2x32xf32>
    %cst_46 = arith.constant 1.000000e+00 : f32
    %154 = vector.broadcast %cst_46 : f32 to vector<2x32xf32>
    %155 = arith.subf %154, %148 : vector<2x32xf32>
    %156 = arith.mulf %155, %153 : vector<2x32xf32>
    %157 = arith.mulf %148, %133 : vector<2x32xf32>
    %158 = arith.addf %156, %157 : vector<2x32xf32>
    %c10_47 = arith.constant 10 : index
    %c0_48 = arith.constant 0 : index
    %159 = vector.load %arg13[%c10_47, %c0_48] : memref<16x32xf32, #tpu.memory_space<vmem>>, vector<2x32xf32>
    tpu.vector_store %arg13[%c10_47, %c0_48], %158 {strides = array<i32>} : memref<16x32xf32, #tpu.memory_space<vmem>>, vector<2x32xf32>,
    %c12 = arith.constant 12 : index
    %c0_49 = arith.constant 0 : index
    %160 = vector.load %arg12[%c12, %c0_49] : memref<16x96xf32, #tpu.memory_space<vmem>>, vector<2x96xf32>
    %cst_50 = arith.constant dense<0.000000e+00> : vector<2x96xf32>
    %161 = tpu.matmul %158, %7, %cst_50 {dimension_numbers = #tpu.dot_dimension_numbers<[1], [0], [0], [1], [0, 0, 1, 1], [], []>} : vector<2x32xf32>, vector<32x96xf32>, vector<2x96xf32> -> vector<2x96xf32>
    %162 = vector.broadcast %8 : vector<1x96xf32> to vector<2x96xf32>
    %163 = arith.addf %161, %162 : vector<2x96xf32>
    %164 = vector.extract_strided_slice %160 {offsets = [0, 0], sizes = [2, 64], strides = [1, 1]} : vector<2x96xf32> to vector<2x64xf32>
    %165 = vector.extract_strided_slice %163 {offsets = [0, 0], sizes = [2, 64], strides = [1, 1]} : vector<2x96xf32> to vector<2x64xf32>
    %166 = arith.addf %164, %165 : vector<2x64xf32>
    %167 = arith.negf %166 : vector<2x64xf32>
    %168 = math.exp %167 : vector<2x64xf32>
    %cst_51 = arith.constant 1.000000e+00 : f32
    %169 = vector.broadcast %cst_51 : f32 to vector<2x64xf32>
    %170 = arith.addf %169, %168 : vector<2x64xf32>
    %171 = arith.divf %169, %170 : vector<2x64xf32>
    %172 = vector.extract_strided_slice %171 {offsets = [0, 0], sizes = [2, 32], strides = [1, 1]} : vector<2x64xf32> to vector<2x32xf32>
    %173 = vector.extract_strided_slice %171 {offsets = [0, 32], sizes = [2, 32], strides = [1, 1]} : vector<2x64xf32> to vector<2x32xf32>
    %174 = vector.extract_strided_slice %160 {offsets = [0, 64], sizes = [2, 32], strides = [1, 1]} : vector<2x96xf32> to vector<2x32xf32>
    %175 = vector.extract_strided_slice %163 {offsets = [0, 64], sizes = [2, 32], strides = [1, 1]} : vector<2x96xf32> to vector<2x32xf32>
    %176 = arith.mulf %172, %175 : vector<2x32xf32>
    %177 = arith.addf %174, %176 : vector<2x32xf32>
    %178 = math.tanh %177 : vector<2x32xf32>
    %cst_52 = arith.constant 1.000000e+00 : f32
    %179 = vector.broadcast %cst_52 : f32 to vector<2x32xf32>
    %180 = arith.subf %179, %173 : vector<2x32xf32>
    %181 = arith.mulf %180, %178 : vector<2x32xf32>
    %182 = arith.mulf %173, %158 : vector<2x32xf32>
    %183 = arith.addf %181, %182 : vector<2x32xf32>
    %c12_53 = arith.constant 12 : index
    %c0_54 = arith.constant 0 : index
    %184 = vector.load %arg13[%c12_53, %c0_54] : memref<16x32xf32, #tpu.memory_space<vmem>>, vector<2x32xf32>
    tpu.vector_store %arg13[%c12_53, %c0_54], %183 {strides = array<i32>} : memref<16x32xf32, #tpu.memory_space<vmem>>, vector<2x32xf32>,
    %c14 = arith.constant 14 : index
    %c0_55 = arith.constant 0 : index
    %185 = vector.load %arg12[%c14, %c0_55] : memref<16x96xf32, #tpu.memory_space<vmem>>, vector<2x96xf32>
    %cst_56 = arith.constant dense<0.000000e+00> : vector<2x96xf32>
    %186 = tpu.matmul %183, %7, %cst_56 {dimension_numbers = #tpu.dot_dimension_numbers<[1], [0], [0], [1], [0, 0, 1, 1], [], []>} : vector<2x32xf32>, vector<32x96xf32>, vector<2x96xf32> -> vector<2x96xf32>
    %187 = vector.broadcast %8 : vector<1x96xf32> to vector<2x96xf32>
    %188 = arith.addf %186, %187 : vector<2x96xf32>
    %189 = vector.extract_strided_slice %185 {offsets = [0, 0], sizes = [2, 64], strides = [1, 1]} : vector<2x96xf32> to vector<2x64xf32>
    %190 = vector.extract_strided_slice %188 {offsets = [0, 0], sizes = [2, 64], strides = [1, 1]} : vector<2x96xf32> to vector<2x64xf32>
    %191 = arith.addf %189, %190 : vector<2x64xf32>
    %192 = arith.negf %191 : vector<2x64xf32>
    %193 = math.exp %192 : vector<2x64xf32>
    %cst_57 = arith.constant 1.000000e+00 : f32
    %194 = vector.broadcast %cst_57 : f32 to vector<2x64xf32>
    %195 = arith.addf %194, %193 : vector<2x64xf32>
    %196 = arith.divf %194, %195 : vector<2x64xf32>
    %197 = vector.extract_strided_slice %196 {offsets = [0, 0], sizes = [2, 32], strides = [1, 1]} : vector<2x64xf32> to vector<2x32xf32>
    %198 = vector.extract_strided_slice %196 {offsets = [0, 32], sizes = [2, 32], strides = [1, 1]} : vector<2x64xf32> to vector<2x32xf32>
    %199 = vector.extract_strided_slice %185 {offsets = [0, 64], sizes = [2, 32], strides = [1, 1]} : vector<2x96xf32> to vector<2x32xf32>
    %200 = vector.extract_strided_slice %188 {offsets = [0, 64], sizes = [2, 32], strides = [1, 1]} : vector<2x96xf32> to vector<2x32xf32>
    %201 = arith.mulf %197, %200 : vector<2x32xf32>
    %202 = arith.addf %199, %201 : vector<2x32xf32>
    %203 = math.tanh %202 : vector<2x32xf32>
    %cst_58 = arith.constant 1.000000e+00 : f32
    %204 = vector.broadcast %cst_58 : f32 to vector<2x32xf32>
    %205 = arith.subf %204, %198 : vector<2x32xf32>
    %206 = arith.mulf %205, %203 : vector<2x32xf32>
    %207 = arith.mulf %198, %183 : vector<2x32xf32>
    %208 = arith.addf %206, %207 : vector<2x32xf32>
    %c14_59 = arith.constant 14 : index
    %c0_60 = arith.constant 0 : index
    %209 = vector.load %arg13[%c14_59, %c0_60] : memref<16x32xf32, #tpu.memory_space<vmem>>, vector<2x32xf32>
    tpu.vector_store %arg13[%c14_59, %c0_60], %208 {strides = array<i32>} : memref<16x32xf32, #tpu.memory_space<vmem>>, vector<2x32xf32>,
    %c0_61 = arith.constant 0 : index
    %c0_62 = arith.constant 0 : index
    %210 = vector.load %arg13[%c0_61, %c0_62] : memref<16x32xf32, #tpu.memory_space<vmem>>, vector<16x32xf32>
    %c0_63 = arith.constant 0 : index
    %c0_64 = arith.constant 0 : index
    %211 = vector.load %arg5[%c0_63, %c0_64] : memref<32x96xf32, #tpu.memory_space<vmem>>, vector<32x96xf32>
    %cst_65 = arith.constant dense<0.000000e+00> : vector<16x96xf32>
    %212 = tpu.matmul %210, %211, %cst_65 {dimension_numbers = #tpu.dot_dimension_numbers<[1], [0], [0], [1], [0, 0, 1, 1], [], []>} : vector<16x32xf32>, vector<32x96xf32>, vector<16x96xf32> -> vector<16x96xf32>
    %c0_66 = arith.constant 0 : index
    %c0_67 = arith.constant 0 : index
    %213 = vector.load %arg7[%c0_66, %c0_67] : memref<1x96xf32, #tpu.memory_space<vmem>>, vector<1x96xf32>
    %214 = vector.broadcast %213 : vector<1x96xf32> to vector<16x96xf32>
    %215 = arith.addf %212, %214 : vector<16x96xf32>
    %c0_68 = arith.constant 0 : index
    %c0_69 = arith.constant 0 : index
    %216 = vector.load %arg12[%c0_68, %c0_69] : memref<16x96xf32, #tpu.memory_space<vmem>>, vector<16x96xf32>
    tpu.vector_store %arg12[%c0_68, %c0_69], %215 {strides = array<i32>} : memref<16x96xf32, #tpu.memory_space<vmem>>, vector<16x96xf32>,
    %c0_70 = arith.constant 0 : index
    %c0_71 = arith.constant 0 : index
    %217 = vector.load %arg6[%c0_70, %c0_71] : memref<32x96xf32, #tpu.memory_space<vmem>>, vector<32x96xf32>
    %c0_72 = arith.constant 0 : index
    %c0_73 = arith.constant 0 : index
    %218 = vector.load %arg8[%c0_72, %c0_73] : memref<1x96xf32, #tpu.memory_space<vmem>>, vector<1x96xf32>
    %cst_74 = arith.constant 0.000000e+00 : f32
    %219 = vector.broadcast %cst_74 : f32 to vector<2x32xf32>
    %c0_75 = arith.constant 0 : index
    %c0_76 = arith.constant 0 : index
    %220 = vector.load %arg12[%c0_75, %c0_76] : memref<16x96xf32, #tpu.memory_space<vmem>>, vector<2x96xf32>
    %cst_77 = arith.constant dense<0.000000e+00> : vector<2x96xf32>
    %221 = tpu.matmul %219, %217, %cst_77 {dimension_numbers = #tpu.dot_dimension_numbers<[1], [0], [0], [1], [0, 0, 1, 1], [], []>} : vector<2x32xf32>, vector<32x96xf32>, vector<2x96xf32> -> vector<2x96xf32>
    %222 = vector.broadcast %218 : vector<1x96xf32> to vector<2x96xf32>
    %223 = arith.addf %221, %222 : vector<2x96xf32>
    %224 = vector.extract_strided_slice %220 {offsets = [0, 0], sizes = [2, 64], strides = [1, 1]} : vector<2x96xf32> to vector<2x64xf32>
    %225 = vector.extract_strided_slice %223 {offsets = [0, 0], sizes = [2, 64], strides = [1, 1]} : vector<2x96xf32> to vector<2x64xf32>
    %226 = arith.addf %224, %225 : vector<2x64xf32>
    %227 = arith.negf %226 : vector<2x64xf32>
    %228 = math.exp %227 : vector<2x64xf32>
    %cst_78 = arith.constant 1.000000e+00 : f32
    %229 = vector.broadcast %cst_78 : f32 to vector<2x64xf32>
    %230 = arith.addf %229, %228 : vector<2x64xf32>
    %231 = arith.divf %229, %230 : vector<2x64xf32>
    %232 = vector.extract_strided_slice %231 {offsets = [0, 0], sizes = [2, 32], strides = [1, 1]} : vector<2x64xf32> to vector<2x32xf32>
    %233 = vector.extract_strided_slice %231 {offsets = [0, 32], sizes = [2, 32], strides = [1, 1]} : vector<2x64xf32> to vector<2x32xf32>
    %234 = vector.extract_strided_slice %220 {offsets = [0, 64], sizes = [2, 32], strides = [1, 1]} : vector<2x96xf32> to vector<2x32xf32>
    %235 = vector.extract_strided_slice %223 {offsets = [0, 64], sizes = [2, 32], strides = [1, 1]} : vector<2x96xf32> to vector<2x32xf32>
    %236 = arith.mulf %232, %235 : vector<2x32xf32>
    %237 = arith.addf %234, %236 : vector<2x32xf32>
    %238 = math.tanh %237 : vector<2x32xf32>
    %cst_79 = arith.constant 1.000000e+00 : f32
    %239 = vector.broadcast %cst_79 : f32 to vector<2x32xf32>
    %240 = arith.subf %239, %233 : vector<2x32xf32>
    %241 = arith.mulf %240, %238 : vector<2x32xf32>
    %242 = arith.mulf %233, %219 : vector<2x32xf32>
    %243 = arith.addf %241, %242 : vector<2x32xf32>
    %c2_80 = arith.constant 2 : index
    %c0_81 = arith.constant 0 : index
    %244 = vector.load %arg12[%c2_80, %c0_81] : memref<16x96xf32, #tpu.memory_space<vmem>>, vector<2x96xf32>
    %cst_82 = arith.constant dense<0.000000e+00> : vector<2x96xf32>
    %245 = tpu.matmul %243, %217, %cst_82 {dimension_numbers = #tpu.dot_dimension_numbers<[1], [0], [0], [1], [0, 0, 1, 1], [], []>} : vector<2x32xf32>, vector<32x96xf32>, vector<2x96xf32> -> vector<2x96xf32>
    %246 = vector.broadcast %218 : vector<1x96xf32> to vector<2x96xf32>
    %247 = arith.addf %245, %246 : vector<2x96xf32>
    %248 = vector.extract_strided_slice %244 {offsets = [0, 0], sizes = [2, 64], strides = [1, 1]} : vector<2x96xf32> to vector<2x64xf32>
    %249 = vector.extract_strided_slice %247 {offsets = [0, 0], sizes = [2, 64], strides = [1, 1]} : vector<2x96xf32> to vector<2x64xf32>
    %250 = arith.addf %248, %249 : vector<2x64xf32>
    %251 = arith.negf %250 : vector<2x64xf32>
    %252 = math.exp %251 : vector<2x64xf32>
    %cst_83 = arith.constant 1.000000e+00 : f32
    %253 = vector.broadcast %cst_83 : f32 to vector<2x64xf32>
    %254 = arith.addf %253, %252 : vector<2x64xf32>
    %255 = arith.divf %253, %254 : vector<2x64xf32>
    %256 = vector.extract_strided_slice %255 {offsets = [0, 0], sizes = [2, 32], strides = [1, 1]} : vector<2x64xf32> to vector<2x32xf32>
    %257 = vector.extract_strided_slice %255 {offsets = [0, 32], sizes = [2, 32], strides = [1, 1]} : vector<2x64xf32> to vector<2x32xf32>
    %258 = vector.extract_strided_slice %244 {offsets = [0, 64], sizes = [2, 32], strides = [1, 1]} : vector<2x96xf32> to vector<2x32xf32>
    %259 = vector.extract_strided_slice %247 {offsets = [0, 64], sizes = [2, 32], strides = [1, 1]} : vector<2x96xf32> to vector<2x32xf32>
    %260 = arith.mulf %256, %259 : vector<2x32xf32>
    %261 = arith.addf %258, %260 : vector<2x32xf32>
    %262 = math.tanh %261 : vector<2x32xf32>
    %cst_84 = arith.constant 1.000000e+00 : f32
    %263 = vector.broadcast %cst_84 : f32 to vector<2x32xf32>
    %264 = arith.subf %263, %257 : vector<2x32xf32>
    %265 = arith.mulf %264, %262 : vector<2x32xf32>
    %266 = arith.mulf %257, %243 : vector<2x32xf32>
    %267 = arith.addf %265, %266 : vector<2x32xf32>
    %c4_85 = arith.constant 4 : index
    %c0_86 = arith.constant 0 : index
    %268 = vector.load %arg12[%c4_85, %c0_86] : memref<16x96xf32, #tpu.memory_space<vmem>>, vector<2x96xf32>
    %cst_87 = arith.constant dense<0.000000e+00> : vector<2x96xf32>
    %269 = tpu.matmul %267, %217, %cst_87 {dimension_numbers = #tpu.dot_dimension_numbers<[1], [0], [0], [1], [0, 0, 1, 1], [], []>} : vector<2x32xf32>, vector<32x96xf32>, vector<2x96xf32> -> vector<2x96xf32>
    %270 = vector.broadcast %218 : vector<1x96xf32> to vector<2x96xf32>
    %271 = arith.addf %269, %270 : vector<2x96xf32>
    %272 = vector.extract_strided_slice %268 {offsets = [0, 0], sizes = [2, 64], strides = [1, 1]} : vector<2x96xf32> to vector<2x64xf32>
    %273 = vector.extract_strided_slice %271 {offsets = [0, 0], sizes = [2, 64], strides = [1, 1]} : vector<2x96xf32> to vector<2x64xf32>
    %274 = arith.addf %272, %273 : vector<2x64xf32>
    %275 = arith.negf %274 : vector<2x64xf32>
    %276 = math.exp %275 : vector<2x64xf32>
    %cst_88 = arith.constant 1.000000e+00 : f32
    %277 = vector.broadcast %cst_88 : f32 to vector<2x64xf32>
    %278 = arith.addf %277, %276 : vector<2x64xf32>
    %279 = arith.divf %277, %278 : vector<2x64xf32>
    %280 = vector.extract_strided_slice %279 {offsets = [0, 0], sizes = [2, 32], strides = [1, 1]} : vector<2x64xf32> to vector<2x32xf32>
    %281 = vector.extract_strided_slice %279 {offsets = [0, 32], sizes = [2, 32], strides = [1, 1]} : vector<2x64xf32> to vector<2x32xf32>
    %282 = vector.extract_strided_slice %268 {offsets = [0, 64], sizes = [2, 32], strides = [1, 1]} : vector<2x96xf32> to vector<2x32xf32>
    %283 = vector.extract_strided_slice %271 {offsets = [0, 64], sizes = [2, 32], strides = [1, 1]} : vector<2x96xf32> to vector<2x32xf32>
    %284 = arith.mulf %280, %283 : vector<2x32xf32>
    %285 = arith.addf %282, %284 : vector<2x32xf32>
    %286 = math.tanh %285 : vector<2x32xf32>
    %cst_89 = arith.constant 1.000000e+00 : f32
    %287 = vector.broadcast %cst_89 : f32 to vector<2x32xf32>
    %288 = arith.subf %287, %281 : vector<2x32xf32>
    %289 = arith.mulf %288, %286 : vector<2x32xf32>
    %290 = arith.mulf %281, %267 : vector<2x32xf32>
    %291 = arith.addf %289, %290 : vector<2x32xf32>
    %c6_90 = arith.constant 6 : index
    %c0_91 = arith.constant 0 : index
    %292 = vector.load %arg12[%c6_90, %c0_91] : memref<16x96xf32, #tpu.memory_space<vmem>>, vector<2x96xf32>
    %cst_92 = arith.constant dense<0.000000e+00> : vector<2x96xf32>
    %293 = tpu.matmul %291, %217, %cst_92 {dimension_numbers = #tpu.dot_dimension_numbers<[1], [0], [0], [1], [0, 0, 1, 1], [], []>} : vector<2x32xf32>, vector<32x96xf32>, vector<2x96xf32> -> vector<2x96xf32>
    %294 = vector.broadcast %218 : vector<1x96xf32> to vector<2x96xf32>
    %295 = arith.addf %293, %294 : vector<2x96xf32>
    %296 = vector.extract_strided_slice %292 {offsets = [0, 0], sizes = [2, 64], strides = [1, 1]} : vector<2x96xf32> to vector<2x64xf32>
    %297 = vector.extract_strided_slice %295 {offsets = [0, 0], sizes = [2, 64], strides = [1, 1]} : vector<2x96xf32> to vector<2x64xf32>
    %298 = arith.addf %296, %297 : vector<2x64xf32>
    %299 = arith.negf %298 : vector<2x64xf32>
    %300 = math.exp %299 : vector<2x64xf32>
    %cst_93 = arith.constant 1.000000e+00 : f32
    %301 = vector.broadcast %cst_93 : f32 to vector<2x64xf32>
    %302 = arith.addf %301, %300 : vector<2x64xf32>
    %303 = arith.divf %301, %302 : vector<2x64xf32>
    %304 = vector.extract_strided_slice %303 {offsets = [0, 0], sizes = [2, 32], strides = [1, 1]} : vector<2x64xf32> to vector<2x32xf32>
    %305 = vector.extract_strided_slice %303 {offsets = [0, 32], sizes = [2, 32], strides = [1, 1]} : vector<2x64xf32> to vector<2x32xf32>
    %306 = vector.extract_strided_slice %292 {offsets = [0, 64], sizes = [2, 32], strides = [1, 1]} : vector<2x96xf32> to vector<2x32xf32>
    %307 = vector.extract_strided_slice %295 {offsets = [0, 64], sizes = [2, 32], strides = [1, 1]} : vector<2x96xf32> to vector<2x32xf32>
    %308 = arith.mulf %304, %307 : vector<2x32xf32>
    %309 = arith.addf %306, %308 : vector<2x32xf32>
    %310 = math.tanh %309 : vector<2x32xf32>
    %cst_94 = arith.constant 1.000000e+00 : f32
    %311 = vector.broadcast %cst_94 : f32 to vector<2x32xf32>
    %312 = arith.subf %311, %305 : vector<2x32xf32>
    %313 = arith.mulf %312, %310 : vector<2x32xf32>
    %314 = arith.mulf %305, %291 : vector<2x32xf32>
    %315 = arith.addf %313, %314 : vector<2x32xf32>
    %c8_95 = arith.constant 8 : index
    %c0_96 = arith.constant 0 : index
    %316 = vector.load %arg12[%c8_95, %c0_96] : memref<16x96xf32, #tpu.memory_space<vmem>>, vector<2x96xf32>
    %cst_97 = arith.constant dense<0.000000e+00> : vector<2x96xf32>
    %317 = tpu.matmul %315, %217, %cst_97 {dimension_numbers = #tpu.dot_dimension_numbers<[1], [0], [0], [1], [0, 0, 1, 1], [], []>} : vector<2x32xf32>, vector<32x96xf32>, vector<2x96xf32> -> vector<2x96xf32>
    %318 = vector.broadcast %218 : vector<1x96xf32> to vector<2x96xf32>
    %319 = arith.addf %317, %318 : vector<2x96xf32>
    %320 = vector.extract_strided_slice %316 {offsets = [0, 0], sizes = [2, 64], strides = [1, 1]} : vector<2x96xf32> to vector<2x64xf32>
    %321 = vector.extract_strided_slice %319 {offsets = [0, 0], sizes = [2, 64], strides = [1, 1]} : vector<2x96xf32> to vector<2x64xf32>
    %322 = arith.addf %320, %321 : vector<2x64xf32>
    %323 = arith.negf %322 : vector<2x64xf32>
    %324 = math.exp %323 : vector<2x64xf32>
    %cst_98 = arith.constant 1.000000e+00 : f32
    %325 = vector.broadcast %cst_98 : f32 to vector<2x64xf32>
    %326 = arith.addf %325, %324 : vector<2x64xf32>
    %327 = arith.divf %325, %326 : vector<2x64xf32>
    %328 = vector.extract_strided_slice %327 {offsets = [0, 0], sizes = [2, 32], strides = [1, 1]} : vector<2x64xf32> to vector<2x32xf32>
    %329 = vector.extract_strided_slice %327 {offsets = [0, 32], sizes = [2, 32], strides = [1, 1]} : vector<2x64xf32> to vector<2x32xf32>
    %330 = vector.extract_strided_slice %316 {offsets = [0, 64], sizes = [2, 32], strides = [1, 1]} : vector<2x96xf32> to vector<2x32xf32>
    %331 = vector.extract_strided_slice %319 {offsets = [0, 64], sizes = [2, 32], strides = [1, 1]} : vector<2x96xf32> to vector<2x32xf32>
    %332 = arith.mulf %328, %331 : vector<2x32xf32>
    %333 = arith.addf %330, %332 : vector<2x32xf32>
    %334 = math.tanh %333 : vector<2x32xf32>
    %cst_99 = arith.constant 1.000000e+00 : f32
    %335 = vector.broadcast %cst_99 : f32 to vector<2x32xf32>
    %336 = arith.subf %335, %329 : vector<2x32xf32>
    %337 = arith.mulf %336, %334 : vector<2x32xf32>
    %338 = arith.mulf %329, %315 : vector<2x32xf32>
    %339 = arith.addf %337, %338 : vector<2x32xf32>
    %c10_100 = arith.constant 10 : index
    %c0_101 = arith.constant 0 : index
    %340 = vector.load %arg12[%c10_100, %c0_101] : memref<16x96xf32, #tpu.memory_space<vmem>>, vector<2x96xf32>
    %cst_102 = arith.constant dense<0.000000e+00> : vector<2x96xf32>
    %341 = tpu.matmul %339, %217, %cst_102 {dimension_numbers = #tpu.dot_dimension_numbers<[1], [0], [0], [1], [0, 0, 1, 1], [], []>} : vector<2x32xf32>, vector<32x96xf32>, vector<2x96xf32> -> vector<2x96xf32>
    %342 = vector.broadcast %218 : vector<1x96xf32> to vector<2x96xf32>
    %343 = arith.addf %341, %342 : vector<2x96xf32>
    %344 = vector.extract_strided_slice %340 {offsets = [0, 0], sizes = [2, 64], strides = [1, 1]} : vector<2x96xf32> to vector<2x64xf32>
    %345 = vector.extract_strided_slice %343 {offsets = [0, 0], sizes = [2, 64], strides = [1, 1]} : vector<2x96xf32> to vector<2x64xf32>
    %346 = arith.addf %344, %345 : vector<2x64xf32>
    %347 = arith.negf %346 : vector<2x64xf32>
    %348 = math.exp %347 : vector<2x64xf32>
    %cst_103 = arith.constant 1.000000e+00 : f32
    %349 = vector.broadcast %cst_103 : f32 to vector<2x64xf32>
    %350 = arith.addf %349, %348 : vector<2x64xf32>
    %351 = arith.divf %349, %350 : vector<2x64xf32>
    %352 = vector.extract_strided_slice %351 {offsets = [0, 0], sizes = [2, 32], strides = [1, 1]} : vector<2x64xf32> to vector<2x32xf32>
    %353 = vector.extract_strided_slice %351 {offsets = [0, 32], sizes = [2, 32], strides = [1, 1]} : vector<2x64xf32> to vector<2x32xf32>
    %354 = vector.extract_strided_slice %340 {offsets = [0, 64], sizes = [2, 32], strides = [1, 1]} : vector<2x96xf32> to vector<2x32xf32>
    %355 = vector.extract_strided_slice %343 {offsets = [0, 64], sizes = [2, 32], strides = [1, 1]} : vector<2x96xf32> to vector<2x32xf32>
    %356 = arith.mulf %352, %355 : vector<2x32xf32>
    %357 = arith.addf %354, %356 : vector<2x32xf32>
    %358 = math.tanh %357 : vector<2x32xf32>
    %cst_104 = arith.constant 1.000000e+00 : f32
    %359 = vector.broadcast %cst_104 : f32 to vector<2x32xf32>
    %360 = arith.subf %359, %353 : vector<2x32xf32>
    %361 = arith.mulf %360, %358 : vector<2x32xf32>
    %362 = arith.mulf %353, %339 : vector<2x32xf32>
    %363 = arith.addf %361, %362 : vector<2x32xf32>
    %c12_105 = arith.constant 12 : index
    %c0_106 = arith.constant 0 : index
    %364 = vector.load %arg12[%c12_105, %c0_106] : memref<16x96xf32, #tpu.memory_space<vmem>>, vector<2x96xf32>
    %cst_107 = arith.constant dense<0.000000e+00> : vector<2x96xf32>
    %365 = tpu.matmul %363, %217, %cst_107 {dimension_numbers = #tpu.dot_dimension_numbers<[1], [0], [0], [1], [0, 0, 1, 1], [], []>} : vector<2x32xf32>, vector<32x96xf32>, vector<2x96xf32> -> vector<2x96xf32>
    %366 = vector.broadcast %218 : vector<1x96xf32> to vector<2x96xf32>
    %367 = arith.addf %365, %366 : vector<2x96xf32>
    %368 = vector.extract_strided_slice %364 {offsets = [0, 0], sizes = [2, 64], strides = [1, 1]} : vector<2x96xf32> to vector<2x64xf32>
    %369 = vector.extract_strided_slice %367 {offsets = [0, 0], sizes = [2, 64], strides = [1, 1]} : vector<2x96xf32> to vector<2x64xf32>
    %370 = arith.addf %368, %369 : vector<2x64xf32>
    %371 = arith.negf %370 : vector<2x64xf32>
    %372 = math.exp %371 : vector<2x64xf32>
    %cst_108 = arith.constant 1.000000e+00 : f32
    %373 = vector.broadcast %cst_108 : f32 to vector<2x64xf32>
    %374 = arith.addf %373, %372 : vector<2x64xf32>
    %375 = arith.divf %373, %374 : vector<2x64xf32>
    %376 = vector.extract_strided_slice %375 {offsets = [0, 0], sizes = [2, 32], strides = [1, 1]} : vector<2x64xf32> to vector<2x32xf32>
    %377 = vector.extract_strided_slice %375 {offsets = [0, 32], sizes = [2, 32], strides = [1, 1]} : vector<2x64xf32> to vector<2x32xf32>
    %378 = vector.extract_strided_slice %364 {offsets = [0, 64], sizes = [2, 32], strides = [1, 1]} : vector<2x96xf32> to vector<2x32xf32>
    %379 = vector.extract_strided_slice %367 {offsets = [0, 64], sizes = [2, 32], strides = [1, 1]} : vector<2x96xf32> to vector<2x32xf32>
    %380 = arith.mulf %376, %379 : vector<2x32xf32>
    %381 = arith.addf %378, %380 : vector<2x32xf32>
    %382 = math.tanh %381 : vector<2x32xf32>
    %cst_109 = arith.constant 1.000000e+00 : f32
    %383 = vector.broadcast %cst_109 : f32 to vector<2x32xf32>
    %384 = arith.subf %383, %377 : vector<2x32xf32>
    %385 = arith.mulf %384, %382 : vector<2x32xf32>
    %386 = arith.mulf %377, %363 : vector<2x32xf32>
    %387 = arith.addf %385, %386 : vector<2x32xf32>
    %c14_110 = arith.constant 14 : index
    %c0_111 = arith.constant 0 : index
    %388 = vector.load %arg12[%c14_110, %c0_111] : memref<16x96xf32, #tpu.memory_space<vmem>>, vector<2x96xf32>
    %cst_112 = arith.constant dense<0.000000e+00> : vector<2x96xf32>
    %389 = tpu.matmul %387, %217, %cst_112 {dimension_numbers = #tpu.dot_dimension_numbers<[1], [0], [0], [1], [0, 0, 1, 1], [], []>} : vector<2x32xf32>, vector<32x96xf32>, vector<2x96xf32> -> vector<2x96xf32>
    %390 = vector.broadcast %218 : vector<1x96xf32> to vector<2x96xf32>
    %391 = arith.addf %389, %390 : vector<2x96xf32>
    %392 = vector.extract_strided_slice %388 {offsets = [0, 0], sizes = [2, 64], strides = [1, 1]} : vector<2x96xf32> to vector<2x64xf32>
    %393 = vector.extract_strided_slice %391 {offsets = [0, 0], sizes = [2, 64], strides = [1, 1]} : vector<2x96xf32> to vector<2x64xf32>
    %394 = arith.addf %392, %393 : vector<2x64xf32>
    %395 = arith.negf %394 : vector<2x64xf32>
    %396 = math.exp %395 : vector<2x64xf32>
    %cst_113 = arith.constant 1.000000e+00 : f32
    %397 = vector.broadcast %cst_113 : f32 to vector<2x64xf32>
    %398 = arith.addf %397, %396 : vector<2x64xf32>
    %399 = arith.divf %397, %398 : vector<2x64xf32>
    %400 = vector.extract_strided_slice %399 {offsets = [0, 0], sizes = [2, 32], strides = [1, 1]} : vector<2x64xf32> to vector<2x32xf32>
    %401 = vector.extract_strided_slice %399 {offsets = [0, 32], sizes = [2, 32], strides = [1, 1]} : vector<2x64xf32> to vector<2x32xf32>
    %402 = vector.extract_strided_slice %388 {offsets = [0, 64], sizes = [2, 32], strides = [1, 1]} : vector<2x96xf32> to vector<2x32xf32>
    %403 = vector.extract_strided_slice %391 {offsets = [0, 64], sizes = [2, 32], strides = [1, 1]} : vector<2x96xf32> to vector<2x32xf32>
    %404 = arith.mulf %400, %403 : vector<2x32xf32>
    %405 = arith.addf %402, %404 : vector<2x32xf32>
    %406 = math.tanh %405 : vector<2x32xf32>
    %cst_114 = arith.constant 1.000000e+00 : f32
    %407 = vector.broadcast %cst_114 : f32 to vector<2x32xf32>
    %408 = arith.subf %407, %401 : vector<2x32xf32>
    %409 = arith.mulf %408, %406 : vector<2x32xf32>
    %410 = arith.mulf %401, %387 : vector<2x32xf32>
    %411 = arith.addf %409, %410 : vector<2x32xf32>
    %c0_115 = arith.constant 0 : index
    %c0_116 = arith.constant 0 : index
    %412 = vector.load %arg9[%c0_115, %c0_116] : memref<32x32xf32, #tpu.memory_space<vmem>>, vector<32x32xf32>
    %cst_117 = arith.constant dense<0.000000e+00> : vector<2x32xf32>
    %413 = tpu.matmul %411, %412, %cst_117 {dimension_numbers = #tpu.dot_dimension_numbers<[1], [0], [0], [1], [0, 0, 1, 1], [], []>} : vector<2x32xf32>, vector<32x32xf32>, vector<2x32xf32> -> vector<2x32xf32>
    %c0_118 = arith.constant 0 : index
    %c0_119 = arith.constant 0 : index
    %414 = vector.load %arg10[%c0_118, %c0_119] : memref<1x32xf32, #tpu.memory_space<vmem>>, vector<1x32xf32>
    %415 = vector.broadcast %414 : vector<1x32xf32> to vector<2x32xf32>
    %416 = arith.addf %413, %415 : vector<2x32xf32>
    %c0_120 = arith.constant 0 : index
    %c0_121 = arith.constant 0 : index
    %417 = vector.load %arg11[%c0_120, %c0_121] : memref<2x32xf32, #tpu.memory_space<vmem>>, vector<2x32xf32>
    tpu.vector_store %arg11[%c0_120, %c0_121], %416 {strides = array<i32>} : memref<2x32xf32, #tpu.memory_space<vmem>>, vector<2x32xf32>,
    return
  }
}

</mosaic_0001>

<bundles_post_ra>
// kernel: tpu_custom_call.1
= control target key start
LH: loop header
LB: loop body
LE: loop exit
PB: predicated region body
PF: predicated region fallthrough
CT: control target
= control target key end

     0   :  { %16 = vsyncpa [#allocation5], 0  ;;  %s1977_s0 = inlined_call_operand.hbm [shape: f32[16,16], index: 0, kind: input, shape index: {}]   ;;  %s1978_s1 = inlined_call_operand.hbm [shape: f32[16,96], index: 1, kind: input, shape index: {}]   ;;  %s1979_s2 = inlined_call_operand.hbm [shape: f32[32,96], index: 2, kind: input, shape index: {}]   ;;  %s1980_s3 = inlined_call_operand.vmem [shape: f32[1,96], index: 3, kind: input, shape index: {}]   ;;  %s1981_s4 = inlined_call_operand.vmem [shape: f32[1,96], index: 4, kind: input, shape index: {}]   ;;  %s1982_s5 = inlined_call_operand.hbm [shape: f32[32,96], index: 5, kind: input, shape index: {}]   ;;  %s1983_s6 = inlined_call_operand.hbm [shape: f32[32,96], index: 6, kind: input, shape index: {}]   ;;  %s1984_s7 = inlined_call_operand.vmem [shape: f32[1,96], index: 7, kind: input, shape index: {}]   ;;  %s1985_s8 = inlined_call_operand.vmem [shape: f32[1,96], index: 8, kind: input, shape index: {}]   ;;  %s1986_s9 = inlined_call_operand.hbm [shape: f32[32,32], index: 9, kind: input, shape index: {}]   ;;  %s1987_s10 = inlined_call_operand.vmem [shape: f32[1,32], index: 10, kind: input, shape index: {}]   ;;  %s1988_s11 = inlined_call_operand.hbm [shape: f32[2,32], index: 11, kind: output, shape index: {}]  }
   0x1   :  { %17 = vsyncpa [#allocation8], 0 }
   0x2   :  { %18 = vsyncpa [#allocation11], 0 }
   0x3   :  { %19 = vsyncpa [#allocation14], 0 }
   0x4   :  { %20 = vsyncpa [#allocation6], 0  ;;  %s38_s19 = sshll.u32 %s1978_s1, 4  ;;  %s1665_s20 = smov [#allocation7]   ;;  %s39_s19 = int_to_ptr.hbm [resolvable:$true] %s38_s19 }
   0x5   :  { %s40_s21 = sshll.u32 %s1665_s20, 4  ;;  %s68_s24 = sshll.u32 %s1982_s5, 4  ;;  %s41_s21 = int_to_ptr.vmem [resolvable:$true] %s40_s21  ;;  %s69_s24 = int_to_ptr.hbm [resolvable:$true] %s68_s24 }
   0x6   :  { %s1666_s25 = smov 128   ;;  %s1667_s26 = smov 8  }
   0x7   :  { %46 = dma.hbm_to_vmem [thread:$0]  %s39_s19, 256, %s41_s21, [#allocation8], %s1666_s25, %s1666_s25, %s1667_s26  }
   0x8   :  { %s1668_s27 = smov [#allocation10]   ;;  %s25_s1 = sshll.u32 %s1977_s0, 4  ;;  %s26_s1 = int_to_ptr.hbm [resolvable:$true] %s25_s1 }
   0x9   :  { %s70_s28 = sshll.u32 %s1668_s27, 4  ;;  %s51_s13 = sshll.u32 %s1979_s2, 4  ;;  %s71_s28 = int_to_ptr.vmem [resolvable:$true] %s70_s28  ;;  %s52_s13 = int_to_ptr.hbm [resolvable:$true] %s51_s13 }
   0xa   :  { %76 = dma.hbm_to_vmem [thread:$0]  %s69_s24, 512, %s71_s28, [#allocation11], %s1666_s25, %s1666_s25, %s1667_s26  }
   0xb   :  { %s1669_s14 = smov [#allocation4]   ;;  %s1670_s16 = smov [#allocation9]  }
   0xc   :  { %s27_s15 = sshll.u32 %s1669_s14, 4  ;;  %s53_s0 = sshll.u32 %s1670_s16, 4  ;;  %s28_s15 = int_to_ptr.vmem [resolvable:$true] %s27_s15  ;;  %s54_s0 = int_to_ptr.vmem [resolvable:$true] %s53_s0 }
   0xd   :  { %33 = dma.hbm_to_vmem [thread:$0]  %s26_s1, 256, %s28_s15, [#allocation5], %s1666_s25, %s1666_s25, %s1667_s26  }
   0xe   :  { %s81_s19 = sshll.u32 %s1983_s6, 4  ;;  %s98_s21 = sshll.u32 %s1986_s9, 4  ;;  %s82_s19 = int_to_ptr.hbm [resolvable:$true] %s81_s19  ;;  %s99_s21 = int_to_ptr.hbm [resolvable:$true] %s98_s21 }
   0xf   :  { %59 = dma.hbm_to_vmem [thread:$0]  %s52_s13, 512, %s54_s0, [#allocation8], %s1666_s25, %s1666_s25, %s1667_s26  }
  0x10   :  { %s1671_s22 = smov [#allocation12]   ;;  %s1672_s24 = smov [#allocation13]  }
  0x11   :  { %s83_s23 = sshll.u32 %s1671_s22, 4  ;;  %s100_s6 = sshll.u32 %s1672_s24, 4  ;;  %s84_s23 = int_to_ptr.vmem [resolvable:$true] %s83_s23  ;;  %s101_s6 = int_to_ptr.vmem [resolvable:$true] %s100_s6 }
  0x12   :  { %89 = dma.hbm_to_vmem [thread:$0]  %s82_s19, 512, %s84_s23, [#allocation11], %s1666_s25, %s1666_s25, %s1667_s26  }
  0x13   :  { %106 = dma.hbm_to_vmem [thread:$0]  %s99_s21, 512, %s101_s6, [#allocation14], %s1666_s25, %s1666_s25, %s1667_s26  }
  0x14   :  { %1655 = dma.done.wait [#allocation5], 256  }
  0x15   :  { %1656 = vsyncadd [#allocation5], 4294967040 }
  0x16   :  { %1657 = dma.done.wait [#allocation8], 768  }
  0x17   :  { %1658 = vsyncadd [#allocation8], 4294966528 }
  0x18   :  { %1659 = dma.done.wait [#allocation11], 1024  }
  0x19   :  { %1660 = vsyncadd [#allocation11], 4294966272 }
  0x1a   :  { %1661 = dma.done.wait [#allocation14], 512  }
  0x1b   :  { %1662 = vsyncadd [#allocation14], 4294966784  ;;  %v136_v0 = vld [vmem:[#allocation7 + $0x8] sm:$0xff]  ;;  %v135_v2 = vld [vmem:[#allocation7] sm:$0xff]  ;;  %vm141_vm0 = vcmask 130048   ;;  %v1673_v7 = vmov 0.0  }
  0x1c   :  { %v177_v1 = vld [vmem:[#allocation9 + $0x18] sm:$0xff]  ;;  %162 = vmatpush.msra.mxu0 %v136_v0  ;;  %v176_v3 = vld [vmem:[#allocation9 + $0x10] sm:$0xff]  ;;  %v133_v4 = vld [vmem:[#allocation4] sm:$0xff]  ;;  %vm171_vm1 = vcmask 785408   ;;  %s1674_s28 = smov 64   ;;  %vm250_vm6 = vcmask 254976  }
  0x1d   :  { %199 = vmatpush.msra.mxu1 %v177_v1  ;;  %v175_v5 = vld [vmem:[#allocation9 + $0x8] sm:$0xff]  ;;  %267 = vmatpush.msra.mxu2 %v177_v1  ;;  %v174_v6 = vld [vmem:[#allocation9] sm:$0xff]  ;;  %vm183_vm7 = vcmask 261120   ;;  %s1676_s5 = smov [#allocation15]   ;;  %s1326_s15 = sshll.u32 %s1988_s11, 4  ;;  %s1327_s15 = int_to_ptr.hbm [resolvable:$true] %s1326_s15 }
  0x1e   :  { %334 = vmatpush.msra.mxu3 %v177_v1  ;;  %163 = vmatpush.msra.mxu0 %v135_v2  ;;  %v1778_v8 = vld [vmem:[%s1980_s3] ss:$0 sm:$0xff]  ;;  %s1675_s3 = smov 96   ;;  %s1324_s12 = sshll.u32 %s1676_s5, 4  ;;  %s1325_s12 = int_to_ptr.vmem [resolvable:$true] %s1324_s12 }
  0x1f   :  { %200 = vmatpush.msra.mxu1 %v176_v3  ;;  %1339 = vmatmul.msk.f32.vlgmr.msra.gmra.mxu0 %vm141_vm0, %v133_v4  ;;  %v1784_v11 = vld [vmem:[%s1981_s4] ss:$0 sm:$0xff] }
  0x20   :  { %268 = vmatpush.msra.mxu2 %v176_v3  ;;  %335 = vmatpush.msra.mxu3 %v176_v3 }
  0x21   :  { %201 = vmatpush.msra.mxu1 %v175_v5  ;;  %602 = vmatpush.msrb.mxu0 %v177_v1 }
  0x22   :  { %269 = vmatpush.msra.mxu2 %v175_v5  ;;  %336 = vmatpush.msra.mxu3 %v175_v5 }
  0x23   :  { %202 = vmatpush.msra.mxu1 %v174_v6  ;;  %603 = vmatpush.msrb.mxu0 %v176_v3 }
  0x24   :  { %203 = vmatmul.f32.vlgmr.msra.gmra.mxu1 %v1673_v7  ;;  %270 = vmatpush.msra.mxu2 %v174_v6 }
  0x25   :  { %337 = vmatpush.msra.mxu3 %v174_v6  ;;  %401 = vmatpush.msrb.mxu1 %v177_v1 }
  0x26   :  { %468 = vmatpush.msrb.mxu2 %v177_v1  ;;  %604 = vmatpush.msrb.mxu0 %v175_v5 }
  0x27   :  { %535 = vmatpush.msrb.mxu3 %v177_v1  ;;  %402 = vmatpush.msrb.mxu1 %v176_v3 }
  0x28   :  { %469 = vmatpush.msrb.mxu2 %v176_v3  ;;  %605 = vmatpush.msrb.mxu0 %v174_v6 }
  0x29   :  { %536 = vmatpush.msrb.mxu3 %v176_v3  ;;  %403 = vmatpush.msrb.mxu1 %v175_v5 }
  0x2a   :  { %470 = vmatpush.msrb.mxu2 %v175_v5 }
  0x2b   :  { %537 = vmatpush.msrb.mxu3 %v175_v5  ;;  %404 = vmatpush.msrb.mxu1 %v174_v6 }
  0x2c   :  { %471 = vmatpush.msrb.mxu2 %v174_v6 }
  0x2d   :  { %538 = vmatpush.msrb.mxu3 %v174_v6  ;;  %669 = vmatpush.msra.mxu1 %v177_v1 }
  0x2f   :  { %670 = vmatpush.msra.mxu1 %v176_v3 }
  0x31   :  { %671 = vmatpush.msra.mxu1 %v175_v5 }
  0x33   :  { %672 = vmatpush.msra.mxu1 %v174_v6 }
  0x9c   :  { %v165_v9 = vpop.f32.mrf.mxu0 }
  0x9d   :  { %v166_v10 = vadd.f32 %v1778_v8, %v165_v9 }
  0x9f   :  { %172 = vst.msk [vmem:[#allocation2] sm:$0xff] %vm171_vm1, %v166_v10 }
  0xa1   :  { %v204_v12 = vpop.f32.mrf.mxu1 }
  0xa2   :  { %v205_v13 = vadd.f32 %v1784_v11, %v204_v12 }
  0xa4   :  { %228 = vrot.lane.b32.xlu0 %v205_v13, %s1674_s28 }
  0xa6   :  { %v179_v14 = vld [vmem:[#allocation2] sm:$0x3]  ;;  %v252_v42 = vld [vmem:[#allocation2 + $0x2] sm:$0x3]  ;;  %v319_v6 = vld [vmem:[#allocation2 + $0x4] sm:$0x3] }
  0xa7   :  { %v207_v15 = vadd.f32 %v205_v13, %v179_v14 }
  0xa9   :  { %v1341_v16 = vmul.f32 -1.442695, %v207_v15 }
  0xab   :  { %1391 = vpow2.f32 %v1341_v16 }
  0xb1   :  { %v1392_v17 = vpop.eup %1391 }
  0xb2   :  { %v211_v18 = vadd.f32 1.0, %v1392_v17 }
  0xb4   :  { %1393 = vrcp.f32 %v211_v18  ;;  %v223_v24 = vand.u32 2147483648, %v211_v18  ;;  %vm217_vm3 = vweird.f32 %v211_v18  ;;  %v221_v25 = vand.u32 2147483647, %v211_v18 }
  0xb6   :  { %v224_v27 = vor.u32 1.1754944e-38, %v223_v24  ;;  %vm222_vm5 = vcmp.eq.f32.partialorder %v221_v25, 8.507059e+37 }
  0xba   :  { %v1394_v19 = vpop.eup %1393 }
  0xbb   :  { %v213_v20 = vmul.f32 %v1394_v19, %v211_v18  ;;  %vm218_vm2 = vweird.f32 %v1394_v19 }
  0xbc   :  { %vm219_vm4 = vmor %vm217_vm3, %vm218_vm2 }
  0xbd   :  { %v214_v21 = vsub.f32 1.0, %v213_v20 }
  0xbf   :  { %v215_v22 = vmul.f32 %v1394_v19, %v214_v21 }
  0xc1   :  { %v216_v23 = vadd.f32 %v1394_v19, %v215_v22 }
  0xc3   :  { %v220_v26 = vsel %vm219_vm4, %v1394_v19, %v216_v23 }
  0xc4   :  { %v225_v29 = vsel %vm222_vm5, %v224_v27, %v220_v26 }
  0xc5   :  { %v238_v34 = vsub.f32 1.0, %v225_v29  ;;  %v244_v36 = vmul.f32 0.0, %v225_v29 }
 0x116   :  { %v229_v28 = vpop.permute.xlu0 %228 }
 0x117   :  { %v231_v30 = vmul.f32 %v229_v28, %v225_v29 }
 0x119   :  { %233 = vrot.lane.b32.xlu0 %v231_v30, %s1674_s28 }
 0x18b   :  { %v234_v31 = vpop.permute.xlu0 %233 }
 0x18c   :  { %v236_v32 = vadd.f32 %v234_v31, %v179_v14 }
 0x18e   :  { %1395 = vtanh.f32 %v236_v32 }
 0x194   :  { %v1396_v33 = vpop.eup %1395 }
 0x195   :  { %240 = vrot.lane.b32.xlu1 %v1396_v33, %s1675_s3 }
 0x207   :  { %v241_v35 = vpop.permute.xlu1 %240 }
 0x208   :  { %v243_v37 = vmul.f32 %v241_v35, %v238_v34 }
 0x20a   :  { %v245_v38 = vadd.f32 %v244_v36, %v243_v37  ;;  %v386_v37 = vld [vmem:[#allocation2 + $0x6] sm:$0x3] }
 0x20c   :  { %247 = vrot.lane.b32.xlu1 %v245_v38, %s1675_s3 }
 0x27e   :  { %v248_v39 = vpop.permute.xlu1 %247 }
 0x27f   :  { %251 = vst.msk [vmem:[#allocation3] sm:$0x3] %vm250_vm6, %v248_v39  ;;  %1342 = vmatmul.msk.f32.vlgmr.msra.gmra.mxu2 %vm183_vm7, %v248_v39 }
 0x302   :  { %v272_v40 = vpop.f32.mrf.mxu2 }
 0x303   :  { %v273_v41 = vadd.f32 %v1784_v11, %v272_v40 }
 0x305   :  { %296 = vrot.lane.b32.xlu2 %v273_v41, %s1674_s28  ;;  %v275_v43 = vadd.f32 %v273_v41, %v252_v42 }
 0x307   :  { %v1343_v44 = vmul.f32 -1.442695, %v275_v43 }
 0x309   :  { %1397 = vpow2.f32 %v1343_v44 }
 0x30f   :  { %v1398_v45 = vpop.eup %1397 }
 0x310   :  { %v279_v46 = vadd.f32 1.0, %v1398_v45 }
 0x312   :  { %1399 = vrcp.f32 %v279_v46  ;;  %v291_v52 = vand.u32 2147483648, %v279_v46  ;;  %vm285_vm9 = vweird.f32 %v279_v46  ;;  %v289_v53 = vand.u32 2147483647, %v279_v46 }
 0x314   :  { %v292_v55 = vor.u32 1.1754944e-38, %v291_v52  ;;  %vm290_vm11 = vcmp.eq.f32.partialorder %v289_v53, 8.507059e+37 }
 0x318   :  { %v1400_v47 = vpop.eup %1399 }
 0x319   :  { %v281_v48 = vmul.f32 %v1400_v47, %v279_v46  ;;  %vm286_vm8 = vweird.f32 %v1400_v47 }
 0x31a   :  { %vm287_vm10 = vmor %vm285_vm9, %vm286_vm8 }
 0x31b   :  { %v282_v49 = vsub.f32 1.0, %v281_v48 }
 0x31d   :  { %v283_v50 = vmul.f32 %v1400_v47, %v282_v49 }
 0x31f   :  { %v284_v51 = vadd.f32 %v1400_v47, %v283_v50 }
 0x321   :  { %v288_v54 = vsel %vm287_vm10, %v1400_v47, %v284_v51 }
 0x322   :  { %v293_v57 = vsel %vm290_vm11, %v292_v55, %v288_v54 }
 0x323   :  { %v306_v62 = vsub.f32 1.0, %v293_v57  ;;  %v312_v0 = vmul.f32 %v293_v57, %v245_v38 }
 0x35f   :  { %v297_v56 = vpop.permute.xlu2 %296 }
 0x360   :  { %v299_v58 = vmul.f32 %v297_v56, %v293_v57  ;;  %v134_v57 = vld [vmem:[#allocation4 + $0x8] sm:$0xff] }
 0x361   :  { %1340 = vmatmul.msk.f32.gmra.mxu0 %vm141_vm0, %v134_v57 }
 0x362   :  { %301 = vrot.lane.b32.xlu2 %v299_v58, %s1674_s28 }
 0x3bc   :  { %v302_v59 = vpop.permute.xlu2 %301 }
 0x3bd   :  { %v304_v60 = vadd.f32 %v302_v59, %v252_v42 }
 0x3bf   :  { %1401 = vtanh.f32 %v304_v60 }
 0x3c5   :  { %v1402_v61 = vpop.eup %1401 }
 0x3c6   :  { %308 = vrot.lane.b32.xlu0 %v1402_v61, %s1675_s3 }
 0x438   :  { %v309_v63 = vpop.permute.xlu0 %308 }
 0x439   :  { %v311_v1 = vmul.f32 %v309_v63, %v306_v62  ;;  %v726_v63 = vld [vmem:[#allocation10 + $0x18] sm:$0xff] }
 0x43a   :  { %749 = vmatpush.msra.mxu2 %v726_v63 }
 0x43b   :  { %v313_v2 = vadd.f32 %v312_v0, %v311_v1  ;;  %v725_v0 = vld [vmem:[#allocation10 + $0x10] sm:$0xff]  ;;  %v724_v1 = vld [vmem:[#allocation10 + $0x8] sm:$0xff] }
 0x43c   :  { %750 = vmatpush.msra.mxu2 %v725_v0 }
 0x43d   :  { %315 = vrot.lane.b32.xlu1 %v313_v2, %s1675_s3 }
 0x43e   :  { %751 = vmatpush.msra.mxu2 %v724_v1 }
 0x4af   :  { %v316_v3 = vpop.permute.xlu1 %315 }
 0x4b0   :  { %318 = vst.msk [vmem:[#allocation3 + $0x2] sm:$0x3] %vm250_vm6, %v316_v3  ;;  %1344 = vmatmul.msk.f32.vlgmr.msra.gmra.mxu3 %vm183_vm7, %v316_v3  ;;  %v168_v3 = vpop.f32.mrf.mxu0 }
 0x533   :  { %v339_v4 = vpop.f32.mrf.mxu3 }
 0x534   :  { %v340_v5 = vadd.f32 %v1784_v11, %v339_v4  ;;  %v169_v4 = vadd.f32 %v1778_v8, %v168_v3 }
 0x536   :  { %363 = vrot.lane.b32.xlu2 %v340_v5, %s1674_s28  ;;  %v342_v9 = vadd.f32 %v340_v5, %v319_v6  ;;  %173 = vst.msk [vmem:[#allocation2 + $0x8] sm:$0xff] %vm171_vm1, %v169_v4 }
 0x538   :  { %v1345_v10 = vmul.f32 -1.442695, %v342_v9 }
 0x53a   :  { %1403 = vpow2.f32 %v1345_v10 }
 0x540   :  { %v1404_v12 = vpop.eup %1403 }
 0x541   :  { %v346_v13 = vadd.f32 1.0, %v1404_v12  ;;  %v1824_v12 = vld [vmem:[%s1984_s7] ss:$0 sm:$0xff] }
 0x543   :  { %1405 = vrcp.f32 %v346_v13  ;;  %v358_v19 = vand.u32 2147483648, %v346_v13  ;;  %vm352_vm13 = vweird.f32 %v346_v13  ;;  %v356_v20 = vand.u32 2147483647, %v346_v13 }
 0x545   :  { %v359_v22 = vor.u32 1.1754944e-38, %v358_v19  ;;  %vm357_vm15 = vcmp.eq.f32.partialorder %v356_v20, 8.507059e+37 }
 0x549   :  { %v1406_v14 = vpop.eup %1405 }
 0x54a   :  { %v348_v15 = vmul.f32 %v1406_v14, %v346_v13  ;;  %vm353_vm12 = vweird.f32 %v1406_v14 }
 0x54b   :  { %vm354_vm14 = vmor %vm352_vm13, %vm353_vm12 }
 0x54c   :  { %v349_v16 = vsub.f32 1.0, %v348_v15 }
 0x54e   :  { %v350_v17 = vmul.f32 %v1406_v14, %v349_v16 }
 0x550   :  { %v351_v18 = vadd.f32 %v1406_v14, %v350_v17 }
 0x552   :  { %v355_v21 = vsel %vm354_vm14, %v1406_v14, %v351_v18  ;;  %v453_v14 = vld [vmem:[#allocation2 + $0x8] sm:$0x3] }
 0x553   :  { %v360_v24 = vsel %vm357_vm15, %v359_v22, %v355_v21 }
 0x554   :  { %v373_v29 = vsub.f32 1.0, %v360_v24  ;;  %v379_v31 = vmul.f32 %v360_v24, %v313_v2  ;;  %v723_v2 = vld [vmem:[#allocation10] sm:$0xff] }
 0x555   :  { %752 = vmatpush.msra.mxu2 %v723_v2 }
 0x590   :  { %v364_v23 = vpop.permute.xlu2 %363 }
 0x591   :  { %v366_v25 = vmul.f32 %v364_v23, %v360_v24 }
 0x593   :  { %368 = vrot.lane.b32.xlu0 %v366_v25, %s1674_s28 }
 0x605   :  { %v369_v26 = vpop.permute.xlu0 %368 }
 0x606   :  { %v371_v27 = vadd.f32 %v369_v26, %v319_v6 }
 0x608   :  { %1407 = vtanh.f32 %v371_v27 }
 0x60e   :  { %v1408_v28 = vpop.eup %1407 }
 0x60f   :  { %375 = vrot.lane.b32.xlu1 %v1408_v28, %s1675_s3 }
 0x681   :  { %v376_v30 = vpop.permute.xlu1 %375 }
 0x682   :  { %v378_v32 = vmul.f32 %v376_v30, %v373_v29 }
 0x684   :  { %v380_v33 = vadd.f32 %v379_v31, %v378_v32 }
 0x686   :  { %382 = vrot.lane.b32.xlu2 %v380_v33, %s1675_s3 }
 0x6e0   :  { %v383_v34 = vpop.permute.xlu2 %382 }
 0x6e1   :  { %385 = vst.msk [vmem:[#allocation3 + $0x4] sm:$0x3] %vm250_vm6, %v383_v34  ;;  %1346 = vmatmul.msk.f32.vlgmr.msrb.gmra.mxu1 %vm183_vm7, %v383_v34 }
 0x75e   :  { %v406_v35 = vpop.f32.mrf.mxu1 }
 0x75f   :  { %v407_v36 = vadd.f32 %v1784_v11, %v406_v35 }
 0x761   :  { %430 = vrot.lane.b32.xlu0 %v407_v36, %s1674_s28  ;;  %v409_v38 = vadd.f32 %v407_v36, %v386_v37 }
 0x763   :  { %v1347_v39 = vmul.f32 -1.442695, %v409_v38 }
 0x765   :  { %1409 = vpow2.f32 %v1347_v39  ;;  %v1834_v39 = vld [vmem:[#allocation12 + $0x18] sm:$0xff] }
 0x766   :  { %783 = vmatpush.msra.mxu3 %v1834_v39  ;;  %848 = vmatpush.msra.mxu0 %v1834_v39 }
 0x767   :  { %913 = vmatpush.msrb.mxu1 %v1834_v39 }
 0x76b   :  { %v1410_v40 = vpop.eup %1409 }
 0x76c   :  { %v413_v41 = vadd.f32 1.0, %v1410_v40  ;;  %v1836_v40 = vld [vmem:[#allocation12 + $0x10] sm:$0xff] }
 0x76d   :  { %784 = vmatpush.msra.mxu3 %v1836_v40  ;;  %849 = vmatpush.msra.mxu0 %v1836_v40 }
 0x76e   :  { %1411 = vrcp.f32 %v413_v41  ;;  %v425_v47 = vand.u32 2147483648, %v413_v41  ;;  %vm419_vm3 = vweird.f32 %v413_v41  ;;  %v423_v48 = vand.u32 2147483647, %v413_v41  ;;  %914 = vmatpush.msrb.mxu1 %v1836_v40 }
 0x770   :  { %v426_v50 = vor.u32 1.1754944e-38, %v425_v47  ;;  %vm424_vm5 = vcmp.eq.f32.partialorder %v423_v48, 8.507059e+37  ;;  %v520_v48 = vld [vmem:[#allocation2 + $0xa] sm:$0x3] }
 0x774   :  { %v1412_v42 = vpop.eup %1411 }
 0x775   :  { %v415_v43 = vmul.f32 %v1412_v42, %v413_v41  ;;  %vm420_vm2 = vweird.f32 %v1412_v42  ;;  %v1840_v41 = vld [vmem:[#allocation12 + $0x8] sm:$0xff] }
 0x776   :  { %vm421_vm4 = vmor %vm419_vm3, %vm420_vm2  ;;  %785 = vmatpush.msra.mxu3 %v1840_v41  ;;  %850 = vmatpush.msra.mxu0 %v1840_v41 }
 0x777   :  { %v416_v44 = vsub.f32 1.0, %v415_v43  ;;  %915 = vmatpush.msrb.mxu1 %v1840_v41 }
 0x779   :  { %v417_v45 = vmul.f32 %v1412_v42, %v416_v44 }
 0x77b   :  { %v418_v46 = vadd.f32 %v1412_v42, %v417_v45 }
 0x77d   :  { %v422_v49 = vsel %vm421_vm4, %v1412_v42, %v418_v46  ;;  %v1846_v42 = vld [vmem:[#allocation12] sm:$0xff] }
 0x77e   :  { %v427_v52 = vsel %vm424_vm5, %v426_v50, %v422_v49  ;;  %786 = vmatpush.msra.mxu3 %v1846_v42  ;;  %851 = vmatpush.msra.mxu0 %v1846_v42  ;;  %v1874_v46 = vld [vmem:[%s1985_s8] ss:$0 sm:$0xff] }
 0x77f   :  { %v440_v58 = vsub.f32 1.0, %v427_v52  ;;  %v446_v60 = vmul.f32 %v427_v52, %v380_v33  ;;  %916 = vmatpush.msrb.mxu1 %v1846_v42 }
 0x7d3   :  { %v431_v51 = vpop.permute.xlu0 %430 }
 0x7d4   :  { %v433_v53 = vmul.f32 %v431_v51, %v427_v52 }
 0x7d6   :  { %435 = vrot.lane.b32.xlu1 %v433_v53, %s1674_s28 }
 0x848   :  { %v436_v54 = vpop.permute.xlu1 %435 }
 0x849   :  { %v438_v55 = vadd.f32 %v436_v54, %v386_v37 }
 0x84b   :  { %1413 = vtanh.f32 %v438_v55 }
 0x851   :  { %v1414_v56 = vpop.eup %1413 }
 0x852   :  { %442 = vrot.lane.b32.xlu2 %v1414_v56, %s1675_s3 }
 0x8ac   :  { %v443_v59 = vpop.permute.xlu2 %442 }
 0x8ad   :  { %v445_v61 = vmul.f32 %v443_v59, %v440_v58 }
 0x8af   :  { %v447_v62 = vadd.f32 %v446_v60, %v445_v61 }
 0x8b1   :  { %449 = vrot.lane.b32.xlu0 %v447_v62, %s1675_s3 }
 0x923   :  { %v450_v5 = vpop.permute.xlu0 %449 }
 0x924   :  { %452 = vst.msk [vmem:[#allocation3 + $0x6] sm:$0x3] %vm250_vm6, %v450_v5  ;;  %1348 = vmatmul.msk.f32.vlgmr.msrb.gmra.mxu2 %vm183_vm7, %v450_v5 }
 0x925   :  { %1173 = vmatpush.msrb.mxu2 %v1834_v39 }
 0x927   :  { %1174 = vmatpush.msrb.mxu2 %v1836_v40 }
 0x929   :  { %1175 = vmatpush.msrb.mxu2 %v1840_v41 }
 0x92b   :  { %v721_v6 = vld [vmem:[#allocation3] sm:$0xff]  ;;  %1176 = vmatpush.msrb.mxu2 %v1846_v42 }
 0x92c   :  { %1356 = vmatmul.msk.f32.vlgmr.msra.gmra.mxu2 %vm183_vm7, %v721_v6 }
 0x9a7   :  { %v473_v9 = vpop.f32.mrf.mxu2 }
 0x9a8   :  { %v474_v10 = vadd.f32 %v1784_v11, %v473_v9 }
 0x9aa   :  { %497 = vrot.lane.b32.xlu1 %v474_v10, %s1674_s28  ;;  %v476_v15 = vadd.f32 %v474_v10, %v453_v14 }
 0x9ac   :  { %v1349_v16 = vmul.f32 -1.442695, %v476_v15 }
 0x9ae   :  { %1415 = vpow2.f32 %v1349_v16 }
 0x9af   :  { %v754_v8 = vpop.f32.mrf.mxu2 }
 0x9b0   :  { %v755_v13 = vadd.f32 %v1824_v12, %v754_v8 }
 0x9b2   :  { %760 = vst.msk [vmem:[#allocation2] sm:$0xff] %vm171_vm1, %v755_v13 }
 0x9b4   :  { %v1416_v17 = vpop.eup %1415 }
 0x9b5   :  { %v480_v18 = vadd.f32 1.0, %v1416_v17 }
 0x9b7   :  { %1417 = vrcp.f32 %v480_v18  ;;  %v492_v24 = vand.u32 2147483648, %v480_v18  ;;  %vm486_vm8 = vweird.f32 %v480_v18  ;;  %v490_v25 = vand.u32 2147483647, %v480_v18 }
 0x9b9   :  { %v493_v27 = vor.u32 1.1754944e-38, %v492_v24  ;;  %vm491_vm10 = vcmp.eq.f32.partialorder %v490_v25, 8.507059e+37  ;;  %v767_v55 = vld [vmem:[#allocation2] sm:$0x3] }
 0x9bd   :  { %v1418_v19 = vpop.eup %1417 }
 0x9be   :  { %v482_v20 = vmul.f32 %v1418_v19, %v480_v18  ;;  %vm487_vm0 = vweird.f32 %v1418_v19 }
 0x9bf   :  { %vm488_vm9 = vmor %vm486_vm8, %vm487_vm0 }
 0x9c0   :  { %v483_v21 = vsub.f32 1.0, %v482_v20 }
 0x9c2   :  { %v484_v22 = vmul.f32 %v1418_v19, %v483_v21 }
 0x9c4   :  { %v485_v23 = vadd.f32 %v1418_v19, %v484_v22 }
 0x9c6   :  { %v489_v26 = vsel %vm488_vm9, %v1418_v19, %v485_v23 }
 0x9c7   :  { %v494_v29 = vsel %vm491_vm10, %v493_v27, %v489_v26 }
 0x9c8   :  { %v507_v34 = vsub.f32 1.0, %v494_v29  ;;  %v513_v36 = vmul.f32 %v494_v29, %v447_v62 }
 0xa1c   :  { %v498_v28 = vpop.permute.xlu1 %497 }
 0xa1d   :  { %v500_v30 = vmul.f32 %v498_v28, %v494_v29 }
 0xa1f   :  { %502 = vrot.lane.b32.xlu2 %v500_v30, %s1674_s28 }
 0xa79   :  { %v503_v31 = vpop.permute.xlu2 %502 }
 0xa7a   :  { %v505_v32 = vadd.f32 %v503_v31, %v453_v14 }
 0xa7c   :  { %1419 = vtanh.f32 %v505_v32 }
 0xa82   :  { %v1420_v33 = vpop.eup %1419 }
 0xa83   :  { %509 = vrot.lane.b32.xlu0 %v1420_v33, %s1675_s3 }
 0xaf5   :  { %v510_v35 = vpop.permute.xlu0 %509 }
 0xaf6   :  { %v512_v37 = vmul.f32 %v510_v35, %v507_v34 }
 0xaf8   :  { %v1830_v38 = vadd.f32 %v513_v36, %v512_v37 }
 0xafa   :  { %516 = vrot.lane.b32.xlu1 %v1830_v38, %s1675_s3 }
 0xb6c   :  { %v517_v43 = vpop.permute.xlu1 %516 }
 0xb6d   :  { %519 = vst.msk [vmem:[#allocation3 + $0x8] sm:$0x3] %vm250_vm6, %v517_v43  ;;  %1350 = vmatmul.msk.f32.vlgmr.msrb.gmra.mxu3 %vm183_vm7, %v517_v43 }
 0xb6e   :  { %978 = vmatpush.msrb.mxu3 %v1834_v39 }
 0xb70   :  { %979 = vmatpush.msrb.mxu3 %v1836_v40 }
 0xb72   :  { %980 = vmatpush.msrb.mxu3 %v1840_v41 }
 0xb74   :  { %981 = vmatpush.msrb.mxu3 %v1846_v42 }
 0xb75   :  { %787 = vmatmul.f32.vlgmr.msra.gmra.mxu3 %v1673_v7 }
 0xb76   :  { %1238 = vmatpush.msra.mxu3 %v1834_v39 }
 0xb78   :  { %1239 = vmatpush.msra.mxu3 %v1836_v40 }
 0xb7a   :  { %1240 = vmatpush.msra.mxu3 %v1840_v41 }
 0xb7c   :  { %1241 = vmatpush.msra.mxu3 %v1846_v42 }
 0xbf0   :  { %v540_v44 = vpop.f32.mrf.mxu3 }
 0xbf1   :  { %v541_v45 = vadd.f32 %v1784_v11, %v540_v44 }
 0xbf3   :  { %564 = vrot.lane.b32.xlu2 %v541_v45, %s1674_s28  ;;  %v543_v49 = vadd.f32 %v541_v45, %v520_v48 }
 0xbf5   :  { %v1351_v50 = vmul.f32 -1.442695, %v543_v49 }
 0xbf7   :  { %1421 = vpow2.f32 %v1351_v50  ;;  %v830_v50 = vld [vmem:[#allocation2 + $0x2] sm:$0x3] }
 0xbf8   :  { %v788_v47 = vpop.f32.mrf.mxu3 }
 0xbf9   :  { %v789_v7 = vadd.f32 %v1874_v46, %v788_v47 }
 0xbfb   :  { %812 = vrot.lane.b32.xlu0 %v789_v7, %s1674_s28  ;;  %v791_v56 = vadd.f32 %v789_v7, %v767_v55  ;;  %v587_v7 = vld [vmem:[#allocation2 + $0xc] sm:$0x3] }
 0xbfd   :  { %v1422_v51 = vpop.eup %1421  ;;  %v1358_v58 = vmul.f32 -1.442695, %v791_v56 }
 0xbfe   :  { %v547_v52 = vadd.f32 1.0, %v1422_v51 }
 0xc00   :  { %1423 = vrcp.f32 %v547_v52  ;;  %v559_v61 = vand.u32 2147483648, %v547_v52  ;;  %vm553_vm12 = vweird.f32 %v547_v52  ;;  %v557_v62 = vand.u32 2147483647, %v547_v52 }
 0xc01   :  { %1425 = vpow2.f32 %v1358_v58 }
 0xc02   :  { %v560_v1 = vor.u32 1.1754944e-38, %v559_v61  ;;  %vm558_vm14 = vcmp.eq.f32.partialorder %v557_v62, 8.507059e+37 }
 0xc06   :  { %v1424_v53 = vpop.eup %1423 }
 0xc07   :  { %v549_v54 = vmul.f32 %v1424_v53, %v547_v52  ;;  %vm554_vm11 = vweird.f32 %v1424_v53  ;;  %v1426_v63 = vpop.eup %1425 }
 0xc08   :  { %vm555_vm13 = vmor %vm553_vm12, %vm554_vm11  ;;  %v795_v2 = vadd.f32 1.0, %v1426_v63 }
 0xc09   :  { %v550_v57 = vsub.f32 1.0, %v549_v54 }
 0xc0a   :  { %1427 = vrcp.f32 %v795_v2  ;;  %v807_v14 = vand.u32 2147483648, %v795_v2  ;;  %vm801_vm2 = vweird.f32 %v795_v2  ;;  %v805_v15 = vand.u32 2147483647, %v795_v2 }
 0xc0b   :  { %v551_v59 = vmul.f32 %v1424_v53, %v550_v57 }
 0xc0c   :  { %v808_v17 = vor.u32 1.1754944e-38, %v807_v14  ;;  %vm806_vm4 = vcmp.eq.f32.partialorder %v805_v15, 8.507059e+37 }
 0xc0d   :  { %v552_v60 = vadd.f32 %v1424_v53, %v551_v59 }
 0xc0f   :  { %v556_v0 = vsel %vm555_vm13, %v1424_v53, %v552_v60 }
 0xc10   :  { %v561_v4 = vsel %vm558_vm14, %v560_v1, %v556_v0  ;;  %v1428_v6 = vpop.eup %1427 }
 0xc11   :  { %v797_v9 = vmul.f32 %v1428_v6, %v795_v2  ;;  %vm802_vm15 = vweird.f32 %v1428_v6  ;;  %v574_v27 = vsub.f32 1.0, %v561_v4  ;;  %v580_v29 = vmul.f32 %v561_v4, %v1830_v38 }
 0xc12   :  { %vm803_vm3 = vmor %vm801_vm2, %vm802_vm15 }
 0xc13   :  { %v798_v10 = vsub.f32 1.0, %v797_v9 }
 0xc15   :  { %v799_v8 = vmul.f32 %v1428_v6, %v798_v10 }
 0xc17   :  { %v800_v13 = vadd.f32 %v1428_v6, %v799_v8 }
 0xc19   :  { %v804_v16 = vsel %vm803_vm3, %v1428_v6, %v800_v13 }
 0xc1a   :  { %v809_v19 = vsel %vm806_vm4, %v808_v17, %v804_v16 }
 0xc1b   :  { %v822_v32 = vsub.f32 1.0, %v809_v19  ;;  %v828_v34 = vmul.f32 0.0, %v809_v19 }
 0xc4d   :  { %v565_v3 = vpop.permute.xlu2 %564 }
 0xc4e   :  { %v567_v5 = vmul.f32 %v565_v3, %v561_v4 }
 0xc50   :  { %569 = vrot.lane.b32.xlu1 %v567_v5, %s1674_s28 }
 0xc6d   :  { %v813_v18 = vpop.permute.xlu0 %812 }
 0xc6e   :  { %v815_v20 = vmul.f32 %v813_v18, %v809_v19 }
 0xc70   :  { %817 = vrot.lane.b32.xlu2 %v815_v20, %s1674_s28 }
 0xcc2   :  { %v570_v21 = vpop.permute.xlu1 %569 }
 0xcc3   :  { %v572_v22 = vadd.f32 %v570_v21, %v520_v48 }
 0xcc5   :  { %1429 = vtanh.f32 %v572_v22 }
 0xcca   :  { %v818_v23 = vpop.permute.xlu2 %817 }
 0xccb   :  { %v1430_v24 = vpop.eup %1429  ;;  %v820_v25 = vadd.f32 %v818_v23, %v767_v55 }
 0xccc   :  { %576 = vrot.lane.b32.xlu0 %v1430_v24, %s1675_s3 }
 0xccd   :  { %1431 = vtanh.f32 %v820_v25 }
 0xcd3   :  { %v1432_v26 = vpop.eup %1431 }
 0xcd4   :  { %824 = vrot.lane.b32.xlu1 %v1432_v26, %s1675_s3 }
 0xd3e   :  { %v577_v28 = vpop.permute.xlu0 %576 }
 0xd3f   :  { %v579_v30 = vmul.f32 %v577_v28, %v574_v27 }
 0xd41   :  { %v1883_v31 = vadd.f32 %v580_v29, %v579_v30 }
 0xd43   :  { %583 = vrot.lane.b32.xlu2 %v1883_v31, %s1675_s3 }
 0xd46   :  { %v825_v33 = vpop.permute.xlu1 %824 }
 0xd47   :  { %v827_v35 = vmul.f32 %v825_v33, %v822_v32 }
 0xd49   :  { %v1887_v36 = vadd.f32 %v828_v34, %v827_v35 }
 0xd4b   :  { %832 = vrot.lane.b32.xlu0 %v1887_v36, %s1675_s3 }
 0xd9d   :  { %v584_v37 = vpop.permute.xlu2 %583 }
 0xd9e   :  { %586 = vst.msk [vmem:[#allocation3 + $0xa] sm:$0x3] %vm250_vm6, %v584_v37  ;;  %1352 = vmatmul.msk.f32.vlgmr.msrb.gmra.mxu0 %vm183_vm7, %v584_v37 }
 0xd9f   :  { %1043 = vmatpush.msrb.mxu0 %v1834_v39 }
 0xda1   :  { %1044 = vmatpush.msrb.mxu0 %v1836_v40 }
 0xda3   :  { %1045 = vmatpush.msrb.mxu0 %v1840_v41 }
 0xda5   :  { %1046 = vmatpush.msrb.mxu0 %v1846_v42 }
 0xdbd   :  { %v833_v38 = vpop.permute.xlu0 %832 }
 0xdbe   :  { %1359 = vmatmul.msk.f32.vlgmr.msra.gmra.mxu0 %vm183_vm7, %v833_v38 }
 0xe1b   :  { %v607_v43 = vpop.f32.mrf.mxu0 }
 0xe1c   :  { %v608_v44 = vadd.f32 %v1784_v11, %v607_v43 }
 0xe1e   :  { %631 = vrot.lane.b32.xlu1 %v608_v44, %s1674_s28  ;;  %v610_v48 = vadd.f32 %v608_v44, %v587_v7 }
 0xe20   :  { %v1353_v49 = vmul.f32 -1.442695, %v610_v48 }
 0xe22   :  { %1433 = vpow2.f32 %v1353_v49 }
 0xe28   :  { %v1434_v53 = vpop.eup %1433 }
 0xe29   :  { %v614_v54 = vadd.f32 1.0, %v1434_v53 }
 0xe2b   :  { %v626_v1 = vand.u32 2147483648, %v614_v54  ;;  %vm620_vm0 = vweird.f32 %v614_v54  ;;  %v624_v2 = vand.u32 2147483647, %v614_v54 }
 0xe2d   :  { %v627_v5 = vor.u32 1.1754944e-38, %v626_v1  ;;  %vm625_vm9 = vcmp.eq.f32.partialorder %v624_v2, 8.507059e+37 }
 0xe3b   :  { %v853_v45 = vpop.f32.mrf.mxu0 }
 0xe3c   :  { %v854_v47 = vadd.f32 %v1874_v46, %v853_v45  ;;  %v895_v45 = vld [vmem:[#allocation2 + $0x4] sm:$0x3] }
 0xe3e   :  { %877 = vrot.lane.b32.xlu2 %v854_v47, %s1674_s28  ;;  %v856_v51 = vadd.f32 %v854_v47, %v830_v50 }
 0xe40   :  { %v1360_v52 = vmul.f32 -1.442695, %v856_v51 }
 0xe42   :  { %1435 = vpow2.f32 %v1360_v52 }
 0xe43   :  { %1437 = vrcp.f32 %v614_v54 }
 0xe48   :  { %v1436_v55 = vpop.eup %1435 }
 0xe49   :  { %v860_v56 = vadd.f32 1.0, %v1436_v55  ;;  %v1438_v57 = vpop.eup %1437 }
 0xe4a   :  { %v616_v58 = vmul.f32 %v1438_v57, %v614_v54  ;;  %vm621_vm5 = vweird.f32 %v1438_v57 }
 0xe4b   :  { %1439 = vrcp.f32 %v860_v56  ;;  %vm622_vm8 = vmor %vm620_vm0, %vm621_vm5  ;;  %v872_v13 = vand.u32 2147483648, %v860_v56  ;;  %vm866_vm11 = vweird.f32 %v860_v56  ;;  %v870_v14 = vand.u32 2147483647, %v860_v56 }
 0xe4c   :  { %v617_v59 = vsub.f32 1.0, %v616_v58 }
 0xe4d   :  { %v873_v16 = vor.u32 1.1754944e-38, %v872_v13  ;;  %vm871_vm13 = vcmp.eq.f32.partialorder %v870_v14, 8.507059e+37 }
 0xe4e   :  { %v618_v61 = vmul.f32 %v1438_v57, %v617_v59 }
 0xe50   :  { %v619_v63 = vadd.f32 %v1438_v57, %v618_v61 }
 0xe51   :  { %v1440_v60 = vpop.eup %1439 }
 0xe52   :  { %v862_v62 = vmul.f32 %v1440_v60, %v860_v56  ;;  %v623_v3 = vsel %vm622_vm8, %v1438_v57, %v619_v63  ;;  %vm867_vm10 = vweird.f32 %v1440_v60 }
 0xe53   :  { %v628_v9 = vsel %vm625_vm9, %v627_v5, %v623_v3  ;;  %vm868_vm12 = vmor %vm866_vm11, %vm867_vm10 }
 0xe54   :  { %v863_v0 = vsub.f32 1.0, %v862_v62  ;;  %v641_v26 = vsub.f32 1.0, %v628_v9  ;;  %v647_v28 = vmul.f32 %v628_v9, %v1883_v31  ;;  %v654_v62 = vld [vmem:[#allocation2 + $0xe] sm:$0x3] }
 0xe56   :  { %v864_v4 = vmul.f32 %v1440_v60, %v863_v0 }
 0xe58   :  { %v865_v8 = vadd.f32 %v1440_v60, %v864_v4 }
 0xe5a   :  { %v869_v15 = vsel %vm868_vm12, %v1440_v60, %v865_v8 }
 0xe5b   :  { %v874_v18 = vsel %vm871_vm13, %v873_v16, %v869_v15 }
 0xe5c   :  { %v887_v32 = vsub.f32 1.0, %v874_v18  ;;  %v893_v34 = vmul.f32 %v874_v18, %v1887_v36 }
 0xe90   :  { %v632_v6 = vpop.permute.xlu1 %631 }
 0xe91   :  { %v634_v10 = vmul.f32 %v632_v6, %v628_v9 }
 0xe93   :  { %636 = vrot.lane.b32.xlu0 %v634_v10, %s1674_s28 }
 0xe98   :  { %v878_v17 = vpop.permute.xlu2 %877 }
 0xe99   :  { %v880_v19 = vmul.f32 %v878_v17, %v874_v18 }
 0xe9b   :  { %882 = vrot.lane.b32.xlu1 %v880_v19, %s1674_s28 }
 0xf05   :  { %v637_v20 = vpop.permute.xlu0 %636 }
 0xf06   :  { %v639_v21 = vadd.f32 %v637_v20, %v587_v7 }
 0xf08   :  { %1441 = vtanh.f32 %v639_v21 }
 0xf0d   :  { %v883_v22 = vpop.permute.xlu1 %882 }
 0xf0e   :  { %v1442_v23 = vpop.eup %1441  ;;  %v885_v24 = vadd.f32 %v883_v22, %v830_v50 }
 0xf0f   :  { %643 = vrot.lane.b32.xlu2 %v1442_v23, %s1675_s3 }
 0xf10   :  { %1443 = vtanh.f32 %v885_v24 }
 0xf16   :  { %v1444_v25 = vpop.eup %1443 }
 0xf17   :  { %889 = vrot.lane.b32.xlu0 %v1444_v25, %s1675_s3 }
 0xf69   :  { %v644_v27 = vpop.permute.xlu2 %643 }
 0xf6a   :  { %v646_v29 = vmul.f32 %v644_v27, %v641_v26 }
 0xf6c   :  { %v1907_v30 = vadd.f32 %v647_v28, %v646_v29  ;;  %v960_v28 = vld [vmem:[#allocation2 + $0x6] sm:$0x3] }
 0xf6e   :  { %650 = vrot.lane.b32.xlu1 %v1907_v30, %s1675_s3 }
 0xf89   :  { %v890_v33 = vpop.permute.xlu0 %889 }
 0xf8a   :  { %v892_v35 = vmul.f32 %v890_v33, %v887_v32 }
 0xf8c   :  { %v894_v37 = vadd.f32 %v893_v34, %v892_v35 }
 0xf8e   :  { %897 = vrot.lane.b32.xlu2 %v894_v37, %s1675_s3 }
 0xfe0   :  { %v651_v38 = vpop.permute.xlu1 %650 }
 0xfe1   :  { %653 = vst.msk [vmem:[#allocation3 + $0xc] sm:$0x3] %vm250_vm6, %v651_v38  ;;  %1354 = vmatmul.msk.f32.vlgmr.msra.gmra.mxu1 %vm183_vm7, %v651_v38 }
 0xfe2   :  { %1108 = vmatpush.msra.mxu1 %v1834_v39 }
 0xfe4   :  { %1109 = vmatpush.msra.mxu1 %v1836_v40 }
 0xfe6   :  { %1110 = vmatpush.msra.mxu1 %v1840_v41 }
 0xfe8   :  { %v898_v31 = vpop.permute.xlu2 %897  ;;  %1111 = vmatpush.msra.mxu1 %v1846_v42 }
 0xfe9   :  { %1361 = vmatmul.msk.f32.vlgmr.msrb.gmra.mxu1 %vm183_vm7, %v898_v31 }
0x105e   :  { %v674_v36 = vpop.f32.mrf.mxu1 }
0x105f   :  { %v675_v58 = vadd.f32 %v1784_v11, %v674_v36 }
0x1061   :  { %v677_v63 = vadd.f32 %v675_v58, %v654_v62 }
0x1063   :  { %v1355_v0 = vmul.f32 -1.442695, %v677_v63 }
0x1066   :  { %v918_v43 = vpop.f32.mrf.mxu1 }
0x1067   :  { %v919_v44 = vadd.f32 %v1874_v46, %v918_v43 }
0x1069   :  { %942 = vrot.lane.b32.xlu0 %v919_v44, %s1674_s28  ;;  %v921_v47 = vadd.f32 %v919_v44, %v895_v45 }
0x106b   :  { %v1362_v7 = vmul.f32 -1.442695, %v921_v47 }
0x106d   :  { %1445 = vpow2.f32 %v1362_v7 }
0x1073   :  { %v1446_v39 = vpop.eup %1445 }
0x1074   :  { %v925_v48 = vadd.f32 1.0, %v1446_v39 }
0x1076   :  { %1447 = vrcp.f32 %v925_v48  ;;  %v937_v51 = vand.u32 2147483648, %v925_v48  ;;  %vm931_vm15 = vweird.f32 %v925_v48  ;;  %v935_v52 = vand.u32 2147483647, %v925_v48 }
0x1078   :  { %v938_v54 = vor.u32 1.1754944e-38, %v937_v51  ;;  %vm936_vm3 = vcmp.eq.f32.partialorder %v935_v52, 8.507059e+37 }
0x107c   :  { %v1448_v40 = vpop.eup %1447 }
0x107d   :  { %v927_v41 = vmul.f32 %v1448_v40, %v925_v48  ;;  %vm932_vm14 = vweird.f32 %v1448_v40 }
0x107e   :  { %vm933_vm2 = vmor %vm931_vm15, %vm932_vm14 }
0x107f   :  { %v928_v49 = vsub.f32 1.0, %v927_v41 }
0x1081   :  { %v929_v50 = vmul.f32 %v1448_v40, %v928_v49 }
0x1083   :  { %v930_v42 = vadd.f32 %v1448_v40, %v929_v50 }
0x1085   :  { %v934_v53 = vsel %vm933_vm2, %v1448_v40, %v930_v42 }
0x1086   :  { %v939_v56 = vsel %vm936_vm3, %v938_v54, %v934_v53 }
0x1087   :  { %v952_v11 = vsub.f32 1.0, %v939_v56  ;;  %v958_v10 = vmul.f32 %v939_v56, %v894_v37 }
0x10db   :  { %v943_v55 = vpop.permute.xlu0 %942 }
0x10dc   :  { %v945_v57 = vmul.f32 %v943_v55, %v939_v56 }
0x10de   :  { %947 = vrot.lane.b32.xlu1 %v945_v57, %s1674_s28 }
0x10e6   :  { %698 = vrot.lane.b32.xlu1 %v675_v58, %s1674_s28 }
0x1150   :  { %v948_v59 = vpop.permute.xlu1 %947 }
0x1151   :  { %v950_v60 = vadd.f32 %v948_v59, %v895_v45 }
0x1153   :  { %1449 = vtanh.f32 %v950_v60 }
0x1154   :  { %1451 = vpow2.f32 %v1355_v0 }
0x1158   :  { %v699_v19 = vpop.permute.xlu1 %698 }
0x1159   :  { %v1450_v61 = vpop.eup %1449 }
0x115a   :  { %954 = vrot.lane.b32.xlu2 %v1450_v61, %s1675_s3  ;;  %v1452_v1 = vpop.eup %1451 }
0x115b   :  { %v681_v2 = vadd.f32 1.0, %v1452_v1 }
0x115d   :  { %1453 = vrcp.f32 %v681_v2  ;;  %v693_v15 = vand.u32 2147483648, %v681_v2  ;;  %vm687_vm5 = vweird.f32 %v681_v2  ;;  %v691_v16 = vand.u32 2147483647, %v681_v2 }
0x115f   :  { %v694_v18 = vor.u32 1.1754944e-38, %v693_v15  ;;  %vm692_vm8 = vcmp.eq.f32.partialorder %v691_v16, 8.507059e+37 }
0x1163   :  { %v1454_v3 = vpop.eup %1453 }
0x1164   :  { %v683_v4 = vmul.f32 %v1454_v3, %v681_v2  ;;  %vm688_vm4 = vweird.f32 %v1454_v3 }
0x1165   :  { %vm689_vm0 = vmor %vm687_vm5, %vm688_vm4 }
0x1166   :  { %v684_v5 = vsub.f32 1.0, %v683_v4 }
0x1168   :  { %v685_v6 = vmul.f32 %v1454_v3, %v684_v5 }
0x116a   :  { %v686_v13 = vadd.f32 %v1454_v3, %v685_v6 }
0x116c   :  { %v690_v17 = vsel %vm689_vm0, %v1454_v3, %v686_v13 }
0x116d   :  { %v695_v20 = vsel %vm692_vm8, %v694_v18, %v690_v17 }
0x116e   :  { %v701_v21 = vmul.f32 %v699_v19, %v695_v20  ;;  %v708_v40 = vsub.f32 1.0, %v695_v20  ;;  %v714_v49 = vmul.f32 %v695_v20, %v1907_v30 }
0x11b4   :  { %v955_v9 = vpop.permute.xlu2 %954 }
0x11b5   :  { %v957_v8 = vmul.f32 %v955_v9, %v952_v11 }
0x11b7   :  { %v1926_v14 = vadd.f32 %v958_v10, %v957_v8 }
0x11b9   :  { %962 = vrot.lane.b32.xlu0 %v1926_v14, %s1675_s3 }
0x11c1   :  { %703 = vrot.lane.b32.xlu0 %v701_v21, %s1674_s28 }
0x122b   :  { %v963_v22 = vpop.permute.xlu0 %962 }
0x122c   :  { %1363 = vmatmul.msk.f32.vlgmr.msrb.gmra.mxu3 %vm183_vm7, %v963_v22 }
0x1233   :  { %v704_v23 = vpop.permute.xlu0 %703 }
0x1234   :  { %v706_v24 = vadd.f32 %v704_v23, %v654_v62 }
0x1236   :  { %1455 = vtanh.f32 %v706_v24 }
0x123c   :  { %v1456_v27 = vpop.eup %1455 }
0x12af   :  { %v983_v25 = vpop.f32.mrf.mxu3 }
0x12b0   :  { %v984_v26 = vadd.f32 %v1874_v46, %v983_v25 }
0x12b2   :  { %1007 = vrot.lane.b32.xlu2 %v984_v26, %s1674_s28  ;;  %v986_v29 = vadd.f32 %v984_v26, %v960_v28 }
0x12b4   :  { %v1364_v32 = vmul.f32 -1.442695, %v986_v29 }
0x12b6   :  { %1457 = vpow2.f32 %v1364_v32 }
0x12ba   :  { %710 = vrot.lane.b32.xlu2 %v1456_v27, %s1675_s3 }
0x12bc   :  { %v1458_v33 = vpop.eup %1457 }
0x12bd   :  { %v990_v34 = vadd.f32 1.0, %v1458_v33 }
0x12bf   :  { %1459 = vrcp.f32 %v990_v34  ;;  %v1002_v43 = vand.u32 2147483648, %v990_v34  ;;  %vm996_vm10 = vweird.f32 %v990_v34  ;;  %v1000_v44 = vand.u32 2147483647, %v990_v34 }
0x12c1   :  { %v1003_v47 = vor.u32 1.1754944e-38, %v1002_v43  ;;  %vm1001_vm12 = vcmp.eq.f32.partialorder %v1000_v44, 8.507059e+37 }
0x12c5   :  { %v1460_v35 = vpop.eup %1459 }
0x12c6   :  { %v992_v37 = vmul.f32 %v1460_v35, %v990_v34  ;;  %vm997_vm9 = vweird.f32 %v1460_v35 }
0x12c7   :  { %vm998_vm11 = vmor %vm996_vm10, %vm997_vm9 }
0x12c8   :  { %v993_v38 = vsub.f32 1.0, %v992_v37 }
0x12ca   :  { %v994_v31 = vmul.f32 %v1460_v35, %v993_v38 }
0x12cc   :  { %v995_v36 = vadd.f32 %v1460_v35, %v994_v31 }
0x12ce   :  { %v999_v45 = vsel %vm998_vm11, %v1460_v35, %v995_v36 }
0x12cf   :  { %v1004_v39 = vsel %vm1001_vm12, %v1003_v47, %v999_v45 }
0x12d0   :  { %v1017_v56 = vsub.f32 1.0, %v1004_v39  ;;  %v1023_v30 = vmul.f32 %v1004_v39, %v1926_v14 }
0x130c   :  { %v1008_v7 = vpop.permute.xlu2 %1007 }
0x130d   :  { %v1010_v48 = vmul.f32 %v1008_v7, %v1004_v39 }
0x130f   :  { %1012 = vrot.lane.b32.xlu1 %v1010_v48, %s1674_s28 }
0x1314   :  { %v711_v41 = vpop.permute.xlu2 %710 }
0x1315   :  { %v713_v50 = vmul.f32 %v711_v41, %v708_v40 }
0x1317   :  { %v715_v42 = vadd.f32 %v714_v49, %v713_v50 }
0x1319   :  { %717 = vrot.lane.b32.xlu1 %v715_v42, %s1675_s3 }
0x1381   :  { %v1013_v51 = vpop.permute.xlu1 %1012 }
0x1382   :  { %v1015_v52 = vadd.f32 %v1013_v51, %v960_v28 }
0x1384   :  { %1461 = vtanh.f32 %v1015_v52 }
0x138a   :  { %v1462_v53 = vpop.eup %1461 }
0x138b   :  { %1019 = vrot.lane.b32.xlu0 %v1462_v53, %s1675_s3  ;;  %v718_v54 = vpop.permute.xlu1 %717 }
0x138c   :  { %720 = vst.msk [vmem:[#allocation3 + $0xe] sm:$0x3] %vm250_vm6, %v718_v54 }
0x1393   :  { %v722_v55 = vld [vmem:[#allocation3 + $0x8] sm:$0xff] }
0x1394   :  { %1357 = vmatmul.msk.f32.gmra.mxu2 %vm183_vm7, %v722_v55 }
0x13fd   :  { %v1020_v57 = vpop.permute.xlu0 %1019 }
0x13fe   :  { %v1022_v58 = vmul.f32 %v1020_v57, %v1017_v56 }
0x1400   :  { %v1024_v59 = vadd.f32 %v1023_v30, %v1022_v58 }
0x1402   :  { %1027 = vrot.lane.b32.xlu2 %v1024_v59, %s1675_s3 }
0x1417   :  { %v757_v60 = vpop.f32.mrf.mxu2 }
0x1418   :  { %v758_v61 = vadd.f32 %v1824_v12, %v757_v60 }
0x141a   :  { %761 = vst.msk [vmem:[#allocation2 + $0x8] sm:$0xff] %vm171_vm1, %v758_v61 }
0x1421   :  { %v1025_v1 = vld [vmem:[#allocation2 + $0x8] sm:$0x3]  ;;  %v1090_v32 = vld [vmem:[#allocation2 + $0xa] sm:$0x3]  ;;  %v1155_v58 = vld [vmem:[#allocation2 + $0xc] sm:$0x3] }
0x145c   :  { %v1028_v62 = vpop.permute.xlu2 %1027 }
0x145d   :  { %1365 = vmatmul.msk.f32.vlgmr.msrb.gmra.mxu0 %vm183_vm7, %v1028_v62 }
0x14da   :  { %v1048_v63 = vpop.f32.mrf.mxu0 }
0x14db   :  { %v1049_v0 = vadd.f32 %v1874_v46, %v1048_v63 }
0x14dd   :  { %1072 = vrot.lane.b32.xlu0 %v1049_v0, %s1674_s28  ;;  %v1051_v2 = vadd.f32 %v1049_v0, %v1025_v1 }
0x14df   :  { %v1366_v3 = vmul.f32 -1.442695, %v1051_v2 }
0x14e1   :  { %1463 = vpow2.f32 %v1366_v3 }
0x14e7   :  { %v1464_v4 = vpop.eup %1463 }
0x14e8   :  { %v1055_v5 = vadd.f32 1.0, %v1464_v4 }
0x14ea   :  { %1465 = vrcp.f32 %v1055_v5  ;;  %v1067_v8 = vand.u32 2147483648, %v1055_v5  ;;  %vm1061_vm13 = vweird.f32 %v1055_v5  ;;  %v1065_v13 = vand.u32 2147483647, %v1055_v5 }
0x14ec   :  { %v1068_v15 = vor.u32 1.1754944e-38, %v1067_v8  ;;  %vm1066_vm15 = vcmp.eq.f32.partialorder %v1065_v13, 8.507059e+37 }
0x14f0   :  { %v1466_v6 = vpop.eup %1465 }
0x14f1   :  { %v1057_v11 = vmul.f32 %v1466_v6, %v1055_v5  ;;  %vm1062_vm1 = vweird.f32 %v1466_v6 }
0x14f2   :  { %vm1063_vm14 = vmor %vm1061_vm13, %vm1062_vm1 }
0x14f3   :  { %v1058_v12 = vsub.f32 1.0, %v1057_v11 }
0x14f5   :  { %v1059_v9 = vmul.f32 %v1466_v6, %v1058_v12 }
0x14f7   :  { %v1060_v10 = vadd.f32 %v1466_v6, %v1059_v9 }
0x14f9   :  { %v1064_v14 = vsel %vm1063_vm14, %v1466_v6, %v1060_v10 }
0x14fa   :  { %v1069_v17 = vsel %vm1066_vm15, %v1068_v15, %v1064_v14 }
0x14fb   :  { %v1082_v22 = vsub.f32 1.0, %v1069_v17  ;;  %v1088_v24 = vmul.f32 %v1069_v17, %v1024_v59 }
0x154f   :  { %v1073_v16 = vpop.permute.xlu0 %1072 }
0x1550   :  { %v1075_v18 = vmul.f32 %v1073_v16, %v1069_v17 }
0x1552   :  { %1077 = vrot.lane.b32.xlu1 %v1075_v18, %s1674_s28 }
0x15c4   :  { %v1078_v19 = vpop.permute.xlu1 %1077 }
0x15c5   :  { %v1080_v20 = vadd.f32 %v1078_v19, %v1025_v1 }
0x15c7   :  { %1467 = vtanh.f32 %v1080_v20 }
0x15cd   :  { %v1468_v21 = vpop.eup %1467 }
0x15ce   :  { %1084 = vrot.lane.b32.xlu2 %v1468_v21, %s1675_s3 }
0x1628   :  { %v1085_v23 = vpop.permute.xlu2 %1084 }
0x1629   :  { %v1087_v25 = vmul.f32 %v1085_v23, %v1082_v22  ;;  %v1220_v23 = vld [vmem:[#allocation2 + $0xe] sm:$0x3] }
0x162b   :  { %v1089_v26 = vadd.f32 %v1088_v24, %v1087_v25 }
0x162d   :  { %1092 = vrot.lane.b32.xlu0 %v1089_v26, %s1675_s3 }
0x169f   :  { %v1093_v27 = vpop.permute.xlu0 %1092 }
0x16a0   :  { %1367 = vmatmul.msk.f32.vlgmr.msra.gmra.mxu1 %vm183_vm7, %v1093_v27 }
0x171d   :  { %v1113_v28 = vpop.f32.mrf.mxu1 }
0x171e   :  { %v1114_v29 = vadd.f32 %v1874_v46, %v1113_v28 }
0x1720   :  { %1137 = vrot.lane.b32.xlu1 %v1114_v29, %s1674_s28  ;;  %v1116_v33 = vadd.f32 %v1114_v29, %v1090_v32 }
0x1722   :  { %v1368_v34 = vmul.f32 -1.442695, %v1116_v33 }
0x1724   :  { %1469 = vpow2.f32 %v1368_v34 }
0x172a   :  { %v1470_v35 = vpop.eup %1469 }
0x172b   :  { %v1120_v37 = vadd.f32 1.0, %v1470_v35 }
0x172d   :  { %1471 = vrcp.f32 %v1120_v37  ;;  %v1132_v45 = vand.u32 2147483648, %v1120_v37  ;;  %vm1126_vm3 = vweird.f32 %v1120_v37  ;;  %v1130_v47 = vand.u32 2147483647, %v1120_v37 }
0x172f   :  { %v1133_v39 = vor.u32 1.1754944e-38, %v1132_v45  ;;  %vm1131_vm5 = vcmp.eq.f32.partialorder %v1130_v47, 8.507059e+37 }
0x1733   :  { %v1472_v38 = vpop.eup %1471 }
0x1734   :  { %v1122_v31 = vmul.f32 %v1472_v38, %v1120_v37  ;;  %vm1127_vm2 = vweird.f32 %v1472_v38 }
0x1735   :  { %vm1128_vm4 = vmor %vm1126_vm3, %vm1127_vm2 }
0x1736   :  { %v1123_v36 = vsub.f32 1.0, %v1122_v31 }
0x1738   :  { %v1124_v43 = vmul.f32 %v1472_v38, %v1123_v36 }
0x173a   :  { %v1125_v44 = vadd.f32 %v1472_v38, %v1124_v43 }
0x173c   :  { %v1129_v7 = vsel %vm1128_vm4, %v1472_v38, %v1125_v44 }
0x173d   :  { %v1134_v40 = vsel %vm1131_vm5, %v1133_v39, %v1129_v7  ;;  %v1288_v7 = vld [vmem:[#allocation13 + $0x18] sm:$0xff]  ;;  %v1287_v39 = vld [vmem:[#allocation13 + $0x10] sm:$0xff] }
0x173e   :  { %v1147_v51 = vsub.f32 1.0, %v1134_v40  ;;  %v1153_v53 = vmul.f32 %v1134_v40, %v1089_v26  ;;  %1310 = vmatpush.msra.mxu0 %v1288_v7 }
0x1740   :  { %1311 = vmatpush.msra.mxu0 %v1287_v39 }
0x1792   :  { %v1138_v48 = vpop.permute.xlu1 %1137 }
0x1793   :  { %v1140_v41 = vmul.f32 %v1138_v48, %v1134_v40  ;;  %v1286_v48 = vld [vmem:[#allocation13 + $0x8] sm:$0xff]  ;;  %v1285_v40 = vld [vmem:[#allocation13] sm:$0xff] }
0x1794   :  { %1312 = vmatpush.msra.mxu0 %v1286_v48 }
0x1795   :  { %1142 = vrot.lane.b32.xlu2 %v1140_v41, %s1674_s28 }
0x1796   :  { %1313 = vmatpush.msra.mxu0 %v1285_v40 }
0x17ef   :  { %v1143_v49 = vpop.permute.xlu2 %1142 }
0x17f0   :  { %v1145_v50 = vadd.f32 %v1143_v49, %v1090_v32 }
0x17f2   :  { %1473 = vtanh.f32 %v1145_v50 }
0x17f8   :  { %v1474_v42 = vpop.eup %1473 }
0x17f9   :  { %1149 = vrot.lane.b32.xlu0 %v1474_v42, %s1675_s3 }
0x186b   :  { %v1150_v52 = vpop.permute.xlu0 %1149 }
0x186c   :  { %v1152_v54 = vmul.f32 %v1150_v52, %v1147_v51 }
0x186e   :  { %v1154_v55 = vadd.f32 %v1153_v53, %v1152_v54  ;;  %v1390_v53 = vld [vmem:[%s1987_s10] ss:$0 sm:$0xff] }
0x1870   :  { %1157 = vrot.lane.b32.xlu1 %v1154_v55, %s1675_s3 }
0x18e2   :  { %v1158_v56 = vpop.permute.xlu1 %1157 }
0x18e3   :  { %1369 = vmatmul.msk.f32.vlgmr.msrb.gmra.mxu2 %vm183_vm7, %v1158_v56 }
0x1966   :  { %v1178_v57 = vpop.f32.mrf.mxu2 }
0x1967   :  { %v1179_v30 = vadd.f32 %v1874_v46, %v1178_v57 }
0x1969   :  { %1202 = vrot.lane.b32.xlu2 %v1179_v30, %s1674_s28  ;;  %v1181_v59 = vadd.f32 %v1179_v30, %v1155_v58 }
0x196b   :  { %v1370_v60 = vmul.f32 -1.442695, %v1181_v59 }
0x196d   :  { %1475 = vpow2.f32 %v1370_v60 }
0x1973   :  { %v1476_v61 = vpop.eup %1475 }
0x1974   :  { %v1185_v62 = vadd.f32 1.0, %v1476_v61 }
0x1976   :  { %1477 = vrcp.f32 %v1185_v62  ;;  %v1197_v4 = vand.u32 2147483648, %v1185_v62  ;;  %vm1191_vm8 = vweird.f32 %v1185_v62  ;;  %v1195_v5 = vand.u32 2147483647, %v1185_v62 }
0x1978   :  { %v1198_v11 = vor.u32 1.1754944e-38, %v1197_v4  ;;  %vm1196_vm10 = vcmp.eq.f32.partialorder %v1195_v5, 8.507059e+37 }
0x197c   :  { %v1478_v63 = vpop.eup %1477 }
0x197d   :  { %v1187_v0 = vmul.f32 %v1478_v63, %v1185_v62  ;;  %vm1192_vm0 = vweird.f32 %v1478_v63 }
0x197e   :  { %vm1193_vm9 = vmor %vm1191_vm8, %vm1192_vm0 }
0x197f   :  { %v1188_v1 = vsub.f32 1.0, %v1187_v0 }
0x1981   :  { %v1189_v2 = vmul.f32 %v1478_v63, %v1188_v1 }
0x1983   :  { %v1190_v3 = vadd.f32 %v1478_v63, %v1189_v2 }
0x1985   :  { %v1194_v6 = vsel %vm1193_vm9, %v1478_v63, %v1190_v3 }
0x1986   :  { %v1199_v9 = vsel %vm1196_vm10, %v1198_v11, %v1194_v6 }
0x1987   :  { %v1212_v15 = vsub.f32 1.0, %v1199_v9  ;;  %v1218_v17 = vmul.f32 %v1199_v9, %v1154_v55 }
0x19c3   :  { %v1203_v12 = vpop.permute.xlu2 %1202 }
0x19c4   :  { %v1205_v10 = vmul.f32 %v1203_v12, %v1199_v9 }
0x19c6   :  { %1207 = vrot.lane.b32.xlu0 %v1205_v10, %s1674_s28 }
0x1a38   :  { %v1208_v8 = vpop.permute.xlu0 %1207 }
0x1a39   :  { %v1210_v13 = vadd.f32 %v1208_v8, %v1155_v58 }
0x1a3b   :  { %1479 = vtanh.f32 %v1210_v13 }
0x1a41   :  { %v1480_v14 = vpop.eup %1479 }
0x1a42   :  { %1214 = vrot.lane.b32.xlu1 %v1480_v14, %s1675_s3 }
0x1ab4   :  { %v1215_v16 = vpop.permute.xlu1 %1214 }
0x1ab5   :  { %v1217_v18 = vmul.f32 %v1215_v16, %v1212_v15 }
0x1ab7   :  { %v1219_v19 = vadd.f32 %v1218_v17, %v1217_v18 }
0x1ab9   :  { %1222 = vrot.lane.b32.xlu2 %v1219_v19, %s1675_s3 }
0x1b13   :  { %v1223_v20 = vpop.permute.xlu2 %1222 }
0x1b14   :  { %1371 = vmatmul.msk.f32.vlgmr.msra.gmra.mxu3 %vm183_vm7, %v1223_v20 }
0x1b97   :  { %v1243_v21 = vpop.f32.mrf.mxu3 }
0x1b98   :  { %v1244_v22 = vadd.f32 %v1874_v46, %v1243_v21 }
0x1b9a   :  { %1267 = vrot.lane.b32.xlu0 %v1244_v22, %s1674_s28  ;;  %v1246_v24 = vadd.f32 %v1244_v22, %v1220_v23 }
0x1b9c   :  { %v1372_v25 = vmul.f32 -1.442695, %v1246_v24 }
0x1b9e   :  { %1481 = vpow2.f32 %v1372_v25 }
0x1ba4   :  { %v1482_v26 = vpop.eup %1481 }
0x1ba5   :  { %v1250_v27 = vadd.f32 1.0, %v1482_v26 }
0x1ba7   :  { %1483 = vrcp.f32 %v1250_v27  ;;  %v1262_v35 = vand.u32 2147483648, %v1250_v27  ;;  %vm1256_vm12 = vweird.f32 %v1250_v27  ;;  %v1260_v37 = vand.u32 2147483647, %v1250_v27 }
0x1ba9   :  { %v1263_v38 = vor.u32 1.1754944e-38, %v1262_v35  ;;  %vm1261_vm13 = vcmp.eq.f32.partialorder %v1260_v37, 8.507059e+37 }
0x1bad   :  { %v1484_v28 = vpop.eup %1483 }
0x1bae   :  { %v1252_v29 = vmul.f32 %v1484_v28, %v1250_v27  ;;  %vm1257_vm11 = vweird.f32 %v1484_v28 }
0x1baf   :  { %vm1258_vm1 = vmor %vm1256_vm12, %vm1257_vm11 }
0x1bb0   :  { %v1253_v32 = vsub.f32 1.0, %v1252_v29 }
0x1bb2   :  { %v1254_v33 = vmul.f32 %v1484_v28, %v1253_v32 }
0x1bb4   :  { %v1255_v34 = vadd.f32 %v1484_v28, %v1254_v33 }
0x1bb6   :  { %v1259_v46 = vsel %vm1258_vm1, %v1484_v28, %v1255_v34 }
0x1bb7   :  { %v1264_v36 = vsel %vm1261_vm13, %v1263_v38, %v1259_v46 }
0x1bb8   :  { %v1277_v41 = vsub.f32 1.0, %v1264_v36  ;;  %v1283_v50 = vmul.f32 %v1264_v36, %v1219_v19 }
0x1c0c   :  { %v1268_v31 = vpop.permute.xlu0 %1267 }
0x1c0d   :  { %v1270_v43 = vmul.f32 %v1268_v31, %v1264_v36 }
0x1c0f   :  { %1272 = vrot.lane.b32.xlu1 %v1270_v43, %s1674_s28 }
0x1c81   :  { %v1273_v44 = vpop.permute.xlu1 %1272 }
0x1c82   :  { %v1275_v45 = vadd.f32 %v1273_v44, %v1220_v23 }
0x1c84   :  { %1485 = vtanh.f32 %v1275_v45 }
0x1c8a   :  { %v1486_v47 = vpop.eup %1485 }
0x1c8b   :  { %1279 = vrot.lane.b32.xlu2 %v1486_v47, %s1675_s3 }
0x1ce5   :  { %v1280_v49 = vpop.permute.xlu2 %1279 }
0x1ce6   :  { %v1282_v42 = vmul.f32 %v1280_v49, %v1277_v41 }
0x1ce8   :  { %v1284_v51 = vadd.f32 %v1283_v50, %v1282_v42 }
0x1cea   :  { %1294 = vrot.lane.b32.xlu0 %v1284_v51, %s1675_s3 }
0x1d5c   :  { %v1295_v52 = vpop.permute.xlu0 %1294 }
0x1d5d   :  { %1373 = vmatmul.msk.f32.vlgmr.msra.gmra.mxu0 %vm183_vm7, %v1295_v52 }
0x1dda   :  { %v1315_v54 = vpop.f32.mrf.mxu0 }
0x1ddb   :  { %v1316_v55 = vadd.f32 %v1390_v53, %v1315_v54 }
0x1ddd   :  { %1318 = vst.msk [vmem:[#allocation15] sm:$0x3] %vm250_vm6, %v1316_v55 }
0x1dde   :  { %1329 = dma.vmem_to_hbm [thread:$0]  %s1325_s12, 32, %s1327_s15, [#allocation6]  }
0x1ddf   :  { %1663 = dma.done.wait [#allocation6], 32  }
0x1de0   :  { %1664 = vsyncadd [#allocation6], 4294967264 }
0x1de1   :  { %1334 = vsyncpa [#allocation5], 1 }
0x1de2   :  { %1335 = vsyncpa [#allocation8], 1 }
0x1de3   :  { %1336 = vsyncpa [#allocation11], 1 }
0x1de4   :  { %1337 = vsyncpa [#allocation14], 1 }
0x1de5   :  { %1338 = vsyncpa [#allocation6], 1 }

</bundles_post_ra>
